<compile_context>
chip_gen: v6e
topology: v6e:2x2x1
jax: 0.10.0
libtpu: 0.0.40
codegen_flags: <defaults>
</compile_context>

<pallas_src>
import math
from functools import partial

import jax
import jax.numpy as jnp
from jax.experimental import pallas as pl
from jax.experimental.pallas import tpu as pltpu

MXU_DTYPE = jnp.bfloat16          # weights / activations streamed as bf16
LN_EPS = 1e-5                     # nn.LayerNorm default (use 1e-12 if the
                                  # reference DecoderBlock uses a custom LN)
VMEM_LIMIT = 64 * 1024 * 1024     # within physical VMEM on v5e/v6e/v7x


def _round_up(x, m):
    return (x + m - 1) // m * m


# ---------------------------------------------------------------------------
# Kernel: tiled matmul + bias (+ optional ReLU epilogue)
# ---------------------------------------------------------------------------

def _matmul_bias_kernel(x_ref, w_ref, b_ref, o_ref, acc_ref, *, activation):
    k = pl.program_id(2)

    @pl.when(k == 0)
    def _():
        acc_ref[...] = jnp.zeros_like(acc_ref)

    acc_ref[...] += jnp.dot(x_ref[...], w_ref[...],
                            preferred_element_type=jnp.float32)

    @pl.when(k == pl.num_programs(2) - 1)
    def _():
        out = acc_ref[...] + b_ref[...].astype(jnp.float32)
        if activation == "relu":
            out = jnp.maximum(out, 0.0)
        o_ref[...] = out.astype(o_ref.dtype)


def pallas_matmul_bias(x, w, b, activation="none", out_dtype=None,
                       tm=256, tn=512, tk=512):
    """x:(M,K) @ w:(K,N) + b:(N,), tiled over (M,N,K) with fp32 accumulation."""
    M, K = x.shape
    N = w.shape[1]
    out_dtype = out_dtype or x.dtype

    # Full-dim blocks whenever a dim fits in one tile -> no per-call padding.
    # (Weights that need lane padding, e.g. the vocab projection, are padded
    #  once at parameter-construction time.)
    tm = min(tm, _round_up(M, 8))
    tn = N if N <= tn else tn
    tk = K if K <= tk else tk
    Mp, Kp, Np = _round_up(M, tm), _round_up(K, tk), _round_up(N, tn)

    xp = jnp.pad(x, ((0, Mp - M), (0, Kp - K))) if (Mp != M or Kp != K) else x
    wp = jnp.pad(w, ((0, Kp - K), (0, Np - N))) if (Kp != K or Np != N) else w
    bp = jnp.pad(b, (0, Np - N)) if Np != N else b

    out = pl.pallas_call(
        partial(_matmul_bias_kernel, activation=activation),
        out_shape=jax.ShapeDtypeStruct((Mp, Np), out_dtype),
        grid=(Mp // tm, Np // tn, Kp // tk),
        in_specs=[
            pl.BlockSpec((tm, tk), lambda i, j, k: (i, k)),
            pl.BlockSpec((tk, tn), lambda i, j, k: (k, j)),
            pl.BlockSpec((1, tn), lambda i, j, k: (0, j)),
        ],
        out_specs=pl.BlockSpec((tm, tn), lambda i, j, k: (i, j)),
        scratch_shapes=[pltpu.VMEM((tm, tn), jnp.float32)],
        compiler_params=pltpu.CompilerParams(
            dimension_semantics=("parallel", "parallel", "arbitrary"),
            vmem_limit_bytes=VMEM_LIMIT),
    )(xp, wp, bp.reshape(1, Np))
    if Mp != M or Np != N:
        out = out[:M, :N]
    return out


# ---------------------------------------------------------------------------
# Kernel: tiled matmul + bias + residual-add + LayerNorm (fused epilogue)
# ---------------------------------------------------------------------------

def _matmul_bias_res_ln_kernel(x_ref, w_ref, b_ref, r_ref, g_ref, bb_ref,
                               o_ref, acc_ref, *, eps):
    k = pl.program_id(1)

    @pl.when(k == 0)
    def _():
        acc_ref[...] = jnp.zeros_like(acc_ref)

    acc_ref[...] += jnp.dot(x_ref[...], w_ref[...],
                            preferred_element_type=jnp.float32)

    @pl.when(k == pl.num_programs(1) - 1)
    def _():
        y = (acc_ref[...] + b_ref[...].astype(jnp.float32)
             + r_ref[...].astype(jnp.float32))
        mean = jnp.mean(y, axis=-1, keepdims=True)
        var = jnp.mean(jnp.square(y - mean), axis=-1, keepdims=True)
        norm = (y - mean) * jax.lax.rsqrt(var + eps)
        o_ref[...] = (norm * g_ref[...].astype(jnp.float32)
                      + bb_ref[...].astype(jnp.float32)).astype(o_ref.dtype)


def pallas_matmul_bias_res_ln(x, w, b, res, gamma, beta,
                              eps=LN_EPS, tm=256, tk=256):
    """LayerNorm(x @ w + b + res) * gamma + beta; LN axis (D) kept whole.
    tk=256 keeps the full-D bf16 weight block inside the v7x VMEM budget."""
    M, K = x.shape
    D = w.shape[1]
    tm = min(tm, _round_up(M, 8))
    tk = K if K <= tk else tk
    Mp, Kp = _round_up(M, tm), _round_up(K, tk)

    xp = jnp.pad(x, ((0, Mp - M), (0, Kp - K))) if (Mp != M or Kp != K) else x
    wp = jnp.pad(w, ((0, Kp - K), (0, 0))) if Kp != K else w
    rp = jnp.pad(res, ((0, Mp - M), (0, 0))) if Mp != M else res

    out = pl.pallas_call(
        partial(_matmul_bias_res_ln_kernel, eps=eps),
        out_shape=jax.ShapeDtypeStruct((Mp, D), x.dtype),
        grid=(Mp // tm, Kp // tk),
        in_specs=[
            pl.BlockSpec((tm, tk), lambda i, k: (i, k)),
            pl.BlockSpec((tk, D), lambda i, k: (k, 0)),
            pl.BlockSpec((1, D), lambda i, k: (0, 0)),
            pl.BlockSpec((tm, D), lambda i, k: (i, 0)),
            pl.BlockSpec((1, D), lambda i, k: (0, 0)),
            pl.BlockSpec((1, D), lambda i, k: (0, 0)),
        ],
        out_specs=pl.BlockSpec((tm, D), lambda i, k: (i, 0)),
        scratch_shapes=[pltpu.VMEM((tm, D), jnp.float32)],
        compiler_params=pltpu.CompilerParams(
            dimension_semantics=("parallel", "arbitrary"),
            vmem_limit_bytes=VMEM_LIMIT),
    )(xp, wp, b.reshape(1, D), rp, gamma.reshape(1, D), beta.reshape(1, D))
    return out[:M] if Mp != M else out


# ---------------------------------------------------------------------------
# Kernel: flash-style attention, all heads per program, online softmax over kv
# ---------------------------------------------------------------------------

def _flash_attn_kernel(q_ref, k_ref, v_ref, bias_ref, o_ref,
                       m_sc, l_sc, acc_sc, *, scale):
    kv = pl.program_id(2)

    @pl.when(kv == 0)
    def _():
        m_sc[...] = jnp.full_like(m_sc, -jnp.inf)
        l_sc[...] = jnp.zeros_like(l_sc)
        acc_sc[...] = jnp.zeros_like(acc_sc)

    # fold the 1/sqrt(dh) scale into q (Sq*dh work, not Sq*tkk per step)
    q = (q_ref[...].astype(jnp.float32) * scale).astype(MXU_DTYPE)  # (H,tq,dh)
    k = k_ref[...]                                                   # (H,tkk,dh)
    # batched contraction on dh (batch dim = head), no k transpose
    s = jax.lax.dot_general(q, k, (((2,), (2,)), ((0,), (0,))),
                            preferred_element_type=jnp.float32)      # (H,tq,tkk)
    s = s + bias_ref[...].astype(jnp.float32)[None, :, :]

    m_new = jnp.maximum(m_sc[...], jnp.max(s, axis=-1, keepdims=True))
    alpha = jnp.exp(m_sc[...] - m_new)
    p = jnp.exp(s - m_new)
    l_sc[...] = alpha * l_sc[...] + jnp.sum(p, axis=-1, keepdims=True)
    acc_sc[...] = alpha * acc_sc[...] + jax.lax.dot_general(
        p.astype(MXU_DTYPE), v_ref[...],
        (((2,), (1,)), ((0,), (0,))), preferred_element_type=jnp.float32)
    m_sc[...] = m_new

    @pl.when(kv == pl.num_programs(2) - 1)
    def _():
        o_ref[...] = (acc_sc[...] *
                      pl.reciprocal(l_sc[...], approx=True)).astype(o_ref.dtype)


def pallas_attention(q, k, v, bias, tq_max=256, tk_max=512):
    """q:(B,H,Sq,dh), k/v:(B,H,Sk,dh), bias:(B,Sq,Sk) additive (bf16).
    Grid (B, q_blocks, kv_blocks); each program handles all H heads so the
    bias block is streamed exactly once per (b, q_block, kv_block)."""
    B, H, Sq, dh = q.shape
    Sk = k.shape[2]

    tq, Sqp = (Sq, Sq) if Sq <= tq_max else (tq_max, _round_up(Sq, tq_max))
    tkk, Skp = (Sk, Sk) if Sk <= tk_max else (tk_max, _round_up(Sk, tk_max))

    if Sqp != Sq:
        q = jnp.pad(q, ((0, 0), (0, 0), (0, Sqp - Sq), (0, 0)))
    if Skp != Sk:
        k = jnp.pad(k, ((0, 0), (0, 0), (0, Skp - Sk), (0, 0)))
        v = jnp.pad(v, ((0, 0), (0, 0), (0, Skp - Sk), (0, 0)))
    if Sqp != Sq or Skp != Sk:
        bias = jnp.pad(bias, ((0, 0), (0, Sqp - Sq), (0, Skp - Sk)),
                       constant_values=-1e9)

    scale = 1.0 / math.sqrt(dh)
    out = pl.pallas_call(
        partial(_flash_attn_kernel, scale=scale),
        out_shape=jax.ShapeDtypeStruct((B, H, Sqp, dh), q.dtype),
        grid=(B, Sqp // tq, Skp // tkk),
        in_specs=[
            pl.BlockSpec((None, H, tq, dh), lambda b, qi, kv: (b, 0, qi, 0)),
            pl.BlockSpec((None, H, tkk, dh), lambda b, qi, kv: (b, 0, kv, 0)),
            pl.BlockSpec((None, H, tkk, dh), lambda b, qi, kv: (b, 0, kv, 0)),
            pl.BlockSpec((None, tq, tkk), lambda b, qi, kv: (b, qi, kv)),
        ],
        out_specs=pl.BlockSpec((None, H, tq, dh),
                               lambda b, qi, kv: (b, 0, qi, 0)),
        scratch_shapes=[
            pltpu.VMEM((H, tq, 1), jnp.float32),
            pltpu.VMEM((H, tq, 1), jnp.float32),
            pltpu.VMEM((H, tq, dh), jnp.float32),
        ],
        compiler_params=pltpu.CompilerParams(
            dimension_semantics=("parallel", "parallel", "arbitrary"),
            vmem_limit_bytes=VMEM_LIMIT),
    )(q, k, v, bias)
    return out[:, :, :Sq] if Sqp != Sq else out


# ---------------------------------------------------------------------------
# Model glue
# ---------------------------------------------------------------------------

def sinusoidal_encoding(max_len, d_model):
    pos = jnp.arange(max_len, dtype=jnp.float32)[:, None]
    two_i = jnp.arange(0, d_model, 2, dtype=jnp.float32)
    denom = jnp.power(10000.0, two_i / d_model)
    pe = jnp.zeros((max_len, d_model), dtype=jnp.float32)
    pe = pe.at[:, 0::2].set(jnp.sin(pos / denom))
    pe = pe.at[:, 1::2].set(jnp.cos(pos / denom))
    return pe


# TODO(synk): head split/merge kept as XLA transposes; with dh < 128 the
# attention blocks cannot be made lane-dense at these shapes anyway.
def _split_heads(x, n_head):  # (B,S,D) -> (B,H,S,dh)
    B, S, D = x.shape
    return x.reshape(B, S, n_head, D // n_head).transpose(0, 2, 1, 3)


def _merge_heads(x):  # (B,H,S,dh) -> (B*S, D)
    B, H, S, dh = x.shape
    return x.transpose(0, 2, 1, 3).reshape(B * S, H * dh)


def self_attention(x, bias, p, n_head):
    B, S, D = x.shape
    qkv = pallas_matmul_bias(x.reshape(B * S, D), p["wqkv"], p["bqkv"])
    qkv = qkv.reshape(B, S, 3, D)
    q = _split_heads(qkv[:, :, 0], n_head)
    k = _split_heads(qkv[:, :, 1], n_head)
    v = _split_heads(qkv[:, :, 2], n_head)
    return _merge_heads(pallas_attention(q, k, v, bias))


def cross_attention(x, enc, bias, p, n_head):
    B, Sq, D = x.shape
    Sk = enc.shape[1]
    q = pallas_matmul_bias(x.reshape(B * Sq, D), p["wq"], p["bq"])
    kv = pallas_matmul_bias(enc.reshape(B * Sk, D), p["wkv"], p["bkv"])
    kv = kv.reshape(B, Sk, 2, D)
    q = _split_heads(q.reshape(B, Sq, D), n_head)
    k = _split_heads(kv[:, :, 0], n_head)
    v = _split_heads(kv[:, :, 1], n_head)
    return _merge_heads(pallas_attention(q, k, v, bias))


def decoder_block(x, enc, trg_bias, src_bias, lp, n_head):
    B, Sq, D = x.shape
    x2d = x.reshape(B * Sq, D)

    # self-attention; output projection fused with residual + LayerNorm
    h = self_attention(x, trg_bias, lp["self_attn"], n_head)
    x2d = pallas_matmul_bias_res_ln(h, lp["self_attn"]["wo"],
                                    lp["self_attn"]["bo"],
                                    x2d, lp["g1"], lp["b1"])

    # encoder-decoder attention; output projection fused with residual + LN
    h = cross_attention(x2d.reshape(B, Sq, D), enc, src_bias,
                        lp["cross_attn"], n_head)
    x2d = pallas_matmul_bias_res_ln(h, lp["cross_attn"]["wo"],
                                    lp["cross_attn"]["bo"],
                                    x2d, lp["g2"], lp["b2"])

    # FFN: linear+ReLU, second linear fused with residual + LayerNorm
    h = pallas_matmul_bias(x2d, lp["w1"], lp["bb1"], activation="relu")
    x2d = pallas_matmul_bias_res_ln(h, lp["w2"], lp["bb2"],
                                    x2d, lp["g3"], lp["b3"])
    return x2d.reshape(B, Sq, D)


@partial(jax.jit, static_argnames=("n_head", "dec_voc_size"))
def decoder_forward(params, trg, src, trg_mask, src_mask, n_head, dec_voc_size):
    """trg: int32 (B,Sq); src: (B,Sk,D) encoder output;
    trg_mask: (B,1,Sq,Sq); src_mask: (B,1,Sq,Sk); 1=keep, 0=masked."""
    B, Sq = trg.shape
    D = params["tok_emb"].shape[1]

    # embedding: token lookup + positional encoding (dropout = eval no-op);
    # activation chain runs in bf16
    x = (params["tok_emb"][trg].astype(jnp.float32)
         + params["pos_enc"][:Sq][None, :, :]).astype(MXU_DTYPE)
    src = src.astype(MXU_DTYPE)

    # additive mask bias (bf16, shared by all layers; streamed once per
    # (b, q_block, kv_block) inside the attention kernel, not per head)
    trg_bias = ((trg_mask[:, 0].astype(jnp.float32) - 1.0)
                * 10000.0).astype(MXU_DTYPE)
    src_bias = ((src_mask[:, 0].astype(jnp.float32) - 1.0)
                * 10000.0).astype(MXU_DTYPE)

    for lp in params["layers"]:
        x = decoder_block(x, src, trg_bias, src_bias, lp, n_head)

    # vocab projection: weight pre-padded to a multiple of 128 at param time,
    # logits produced in fp32
    out = pallas_matmul_bias(x.reshape(B * Sq, D), params["w_out"],
                             params["b_out"], out_dtype=jnp.float32)
    vp = params["w_out"].shape[1]
    return out.reshape(B, Sq, vp)[:, :, :dec_voc_size]


# ---------------------------------------------------------------------------
# Deterministic parameter construction (bf16 weights, QKV/KV stored fused,
# vocab projection pre-padded to a lane-dense width)
# ---------------------------------------------------------------------------

def make_params(key, dec_voc_size, max_len, d_model, ffn_hidden, n_layers):
    wdt = MXU_DTYPE

    def nrm(k, shape, scale=0.02):
        return (scale * jax.random.normal(k, shape, dtype=jnp.float32)).astype(wdt)

    keys = iter(jax.random.split(key, 4 + n_layers * 8))
    zeros = lambda n: jnp.zeros((n,), jnp.float32)
    ones = lambda n: jnp.ones((n,), jnp.float32)

    layers = []
    for _ in range(n_layers):
        layers.append({
            "self_attn": {
                "wqkv": nrm(next(keys), (d_model, 3 * d_model)),
                "bqkv": zeros(3 * d_model),
                "wo": nrm(next(keys), (d_model, d_model)), "bo": zeros(d_model),
            },
            "g1": ones(d_model), "b1": zeros(d_model),
            "cross_attn": {
                "wq": nrm(next(keys), (d_model, d_model)), "bq": zeros(d_model),
                "wkv": nrm(next(keys), (d_model, 2 * d_model)),
                "bkv": zeros(2 * d_model),
                "wo": nrm(next(keys), (d_model, d_model)), "bo": zeros(d_model),
            },
            "g2": ones(d_model), "b2": zeros(d_model),
            "w1": nrm(next(keys), (d_model, ffn_hidden)), "bb1": zeros(ffn_hidden),
            "w2": nrm(next(keys), (ffn_hidden, d_model)), "bb2": zeros(d_model),
            "g3": ones(d_model), "b3": zeros(d_model),
        })

    vp = _round_up(dec_voc_size, 128)
    w_out = nrm(next(keys), (d_model, dec_voc_size))
    w_out = jnp.pad(w_out, ((0, 0), (0, vp - dec_voc_size)))  # pad once here

    return {
        "tok_emb": jax.random.normal(next(keys), (dec_voc_size, d_model),
                                     dtype=jnp.float32).astype(wdt),
        "pos_enc": sinusoidal_encoding(max_len, d_model),
        "layers": layers,
        "w_out": w_out,
        "b_out": zeros(vp),
    }


# ---------------------------------------------------------------------------
# Main
# ---------------------------------------------------------------------------

if __name__ == "__main__":
    B = 2
    trg_len = 8
    src_len = 8
    d_model = 32
    n_head = 4
    ffn_hidden = 64
    n_layers = 2
    dec_voc_size = 50
    max_len = 16

    key = jax.random.PRNGKey(0)
    k_par, k_trg, k_src = jax.random.split(key, 3)

    params = make_params(k_par, dec_voc_size, max_len, d_model,
                         ffn_hidden, n_layers)

    trg = jax.random.randint(k_trg, (B, trg_len), 0, dec_voc_size,
                             dtype=jnp.int32)
    src = 0.1 * jax.random.normal(k_src, (B, src_len, d_model),
                                  dtype=jnp.float32)

    # causal target mask, all-ones source mask (1 = keep, 0 = masked)
    trg_mask = jnp.tril(jnp.ones((trg_len, trg_len),
                                 jnp.float32))[None, None].repeat(B, axis=0)
    src_mask = jnp.ones((B, 1, trg_len, src_len), jnp.float32)

    out = decoder_forward(params, trg, src, trg_mask, src_mask,
                          n_head=n_head, dec_voc_size=dec_voc_size)
    out = jax.block_until_ready(out)

    assert out.shape == (B, trg_len, dec_voc_size)
    assert jnp.all(jnp.isfinite(out))
    print("KERNEL_OK")
</pallas_src>

<mosaic_0001>
module attributes {stable_mosaic.version = 11 : i64} {
  func.func @_matmul_bias_kernel(%arg0: i32, %arg1: i32, %arg2: i32, %arg3: memref<16x32xbf16, #tpu.memory_space<vmem>>, %arg4: memref<32x96xbf16, #tpu.memory_space<vmem>>, %arg5: memref<1x96xf32, #tpu.memory_space<vmem>>, %arg6: memref<16x96xbf16, #tpu.memory_space<vmem>>, %arg7: memref<16x96xf32, #tpu.memory_space<vmem>>) attributes {dimension_semantics = [#tpu.dimension_semantics<parallel>, #tpu.dimension_semantics<parallel>, #tpu.dimension_semantics<arbitrary>], iteration_bounds = array<i64: 1, 1, 1>, scalar_prefetch = 0 : i64, scratch_operands = 1 : i64, tpu.core_type = #tpu.core_type<tc>, window_params = [{transform_indices = @transform_0, window_bounds = array<i64: 16, 32>}, {transform_indices = @transform_1, window_bounds = array<i64: 32, 96>}, {transform_indices = @transform_2, window_bounds = array<i64: 1, 96>}, {transform_indices = @transform_3, window_bounds = array<i64: 16, 96>}]} {
    %c0_i32 = arith.constant 0 : i32
    %0 = arith.cmpi eq, %arg2, %c0_i32 : i32
    %1 = arith.extui %0 : i1 to i32
    %c0_i32_0 = arith.constant 0 : i32
    %2 = arith.cmpi ne, %1, %c0_i32_0 : i32
    scf.if %2 {
      %cst_10 = arith.constant 0.000000e+00 : f32
      %12 = vector.broadcast %cst_10 : f32 to vector<16x96xf32>
      %c0_11 = arith.constant 0 : index
      %c0_12 = arith.constant 0 : index
      %13 = vector.load %arg7[%c0_11, %c0_12] : memref<16x96xf32, #tpu.memory_space<vmem>>, vector<16x96xf32>
      tpu.vector_store %arg7[%c0_11, %c0_12], %12 {strides = array<i32>} : memref<16x96xf32, #tpu.memory_space<vmem>>, vector<16x96xf32>,
    } else {
    }
    %c0 = arith.constant 0 : index
    %c0_1 = arith.constant 0 : index
    %3 = vector.load %arg7[%c0, %c0_1] : memref<16x96xf32, #tpu.memory_space<vmem>>, vector<16x96xf32>
    %c0_2 = arith.constant 0 : index
    %c0_3 = arith.constant 0 : index
    %4 = vector.load %arg3[%c0_2, %c0_3] : memref<16x32xbf16, #tpu.memory_space<vmem>>, vector<16x32xbf16>
    %c0_4 = arith.constant 0 : index
    %c0_5 = arith.constant 0 : index
    %5 = vector.load %arg4[%c0_4, %c0_5] : memref<32x96xbf16, #tpu.memory_space<vmem>>, vector<32x96xbf16>
    %cst = arith.constant dense<0.000000e+00> : vector<16x96xf32>
    %6 = tpu.matmul %4, %5, %cst {dimension_numbers = #tpu.dot_dimension_numbers<[1], [0], [0], [1], [0, 0, 1, 1], [], []>} : vector<16x32xbf16>, vector<32x96xbf16>, vector<16x96xf32> -> vector<16x96xf32>
    %7 = arith.addf %3, %6 : vector<16x96xf32>
    %c0_6 = arith.constant 0 : index
    %c0_7 = arith.constant 0 : index
    %8 = vector.load %arg7[%c0_6, %c0_7] : memref<16x96xf32, #tpu.memory_space<vmem>>, vector<16x96xf32>
    tpu.vector_store %arg7[%c0_6, %c0_7], %7 {strides = array<i32>} : memref<16x96xf32, #tpu.memory_space<vmem>>, vector<16x96xf32>,
    %c0_i32_8 = arith.constant 0 : i32
    %9 = arith.cmpi eq, %arg2, %c0_i32_8 : i32
    %10 = arith.extui %9 : i1 to i32
    %c0_i32_9 = arith.constant 0 : i32
    %11 = arith.cmpi ne, %10, %c0_i32_9 : i32
    scf.if %11 {
      %c0_10 = arith.constant 0 : index
      %c0_11 = arith.constant 0 : index
      %12 = vector.load %arg7[%c0_10, %c0_11] : memref<16x96xf32, #tpu.memory_space<vmem>>, vector<16x96xf32>
      %c0_12 = arith.constant 0 : index
      %c0_13 = arith.constant 0 : index
      %13 = vector.load %arg5[%c0_12, %c0_13] : memref<1x96xf32, #tpu.memory_space<vmem>>, vector<1x96xf32>
      %14 = vector.broadcast %13 : vector<1x96xf32> to vector<16x96xf32>
      %15 = arith.addf %12, %14 : vector<16x96xf32>
      %16 = arith.truncf %15 : vector<16x96xf32> to vector<16x96xbf16>
      %c0_14 = arith.constant 0 : index
      %c0_15 = arith.constant 0 : index
      %17 = vector.load %arg6[%c0_14, %c0_15] : memref<16x96xbf16, #tpu.memory_space<vmem>>, vector<16x96xbf16>
      tpu.vector_store %arg6[%c0_14, %c0_15], %16 {strides = array<i32>} : memref<16x96xbf16, #tpu.memory_space<vmem>>, vector<16x96xbf16>,
    } else {
    }
    return
  }
  func.func @transform_0(%arg0: i32, %arg1: i32, %arg2: i32) -> (i32, i32) {
    %c0_i32 = arith.constant 0 : i32
    return %arg0, %arg2 : i32, i32
  }
  func.func @transform_1(%arg0: i32, %arg1: i32, %arg2: i32) -> (i32, i32) {
    %c0_i32 = arith.constant 0 : i32
    return %arg2, %arg1 : i32, i32
  }
  func.func @transform_2(%arg0: i32, %arg1: i32, %arg2: i32) -> (i32, i32) {
    %c0_i32 = arith.constant 0 : i32
    %c0_i32_0 = arith.constant 0 : i32
    return %c0_i32, %arg1 : i32, i32
  }
  func.func @transform_3(%arg0: i32, %arg1: i32, %arg2: i32) -> (i32, i32) {
    %c0_i32 = arith.constant 0 : i32
    return %arg0, %arg1 : i32, i32
  }
}

module attributes {stable_mosaic.version = 11 : i64} {
  func.func @_flash_attn_kernel(%arg0: i32, %arg1: i32, %arg2: i32, %arg3: memref<1x4x8x8xbf16, #tpu.memory_space<vmem>>, %arg4: memref<1x4x8x8xbf16, #tpu.memory_space<vmem>>, %arg5: memref<1x4x8x8xbf16, #tpu.memory_space<vmem>>, %arg6: memref<1x8x8xbf16, #tpu.memory_space<vmem>>, %arg7: memref<1x4x8x8xbf16, #tpu.memory_space<vmem>>, %arg8: memref<4x8x1xf32, #tpu.memory_space<vmem>>, %arg9: memref<4x8x1xf32, #tpu.memory_space<vmem>>, %arg10: memref<4x8x8xf32, #tpu.memory_space<vmem>>) attributes {dimension_semantics = [#tpu.dimension_semantics<parallel>, #tpu.dimension_semantics<parallel>, #tpu.dimension_semantics<arbitrary>], iteration_bounds = array<i64: 2, 1, 1>, scalar_prefetch = 0 : i64, scratch_operands = 3 : i64, tpu.core_type = #tpu.core_type<tc>, window_params = [{transform_indices = @transform_0, window_bounds = array<i64: 1, 4, 8, 8>}, {transform_indices = @transform_1, window_bounds = array<i64: 1, 4, 8, 8>}, {transform_indices = @transform_2, window_bounds = array<i64: 1, 4, 8, 8>}, {transform_indices = @transform_3, window_bounds = array<i64: 1, 8, 8>}, {transform_indices = @transform_4, window_bounds = array<i64: 1, 4, 8, 8>}]} {
    %c0_i32 = arith.constant 0 : i32
    %0 = arith.cmpi eq, %arg2, %c0_i32 : i32
    %1 = arith.extui %0 : i1 to i32
    %c0_i32_0 = arith.constant 0 : i32
    %2 = arith.cmpi ne, %1, %c0_i32_0 : i32
    scf.if %2 {
      %cst_42 = arith.constant 0xFF800000 : f32
      %47 = vector.broadcast %cst_42 : f32 to vector<4x8x1xf32>
      %c0_43 = arith.constant 0 : index
      %c0_44 = arith.constant 0 : index
      %c0_45 = arith.constant 0 : index
      %48 = vector.load %arg8[%c0_43, %c0_44, %c0_45] : memref<4x8x1xf32, #tpu.memory_space<vmem>>, vector<4x8x1xf32>
      tpu.vector_store %arg8[%c0_43, %c0_44, %c0_45], %47 {strides = array<i32>} : memref<4x8x1xf32, #tpu.memory_space<vmem>>, vector<4x8x1xf32>,
      %cst_46 = arith.constant 0.000000e+00 : f32
      %49 = vector.broadcast %cst_46 : f32 to vector<4x8x1xf32>
      %c0_47 = arith.constant 0 : index
      %c0_48 = arith.constant 0 : index
      %c0_49 = arith.constant 0 : index
      %50 = vector.load %arg9[%c0_47, %c0_48, %c0_49] : memref<4x8x1xf32, #tpu.memory_space<vmem>>, vector<4x8x1xf32>
      tpu.vector_store %arg9[%c0_47, %c0_48, %c0_49], %49 {strides = array<i32>} : memref<4x8x1xf32, #tpu.memory_space<vmem>>, vector<4x8x1xf32>,
      %cst_50 = arith.constant 0.000000e+00 : f32
      %51 = vector.broadcast %cst_50 : f32 to vector<4x8x8xf32>
      %c0_51 = arith.constant 0 : index
      %c0_52 = arith.constant 0 : index
      %c0_53 = arith.constant 0 : index
      %52 = vector.load %arg10[%c0_51, %c0_52, %c0_53] : memref<4x8x8xf32, #tpu.memory_space<vmem>>, vector<4x8x8xf32>
      tpu.vector_store %arg10[%c0_51, %c0_52, %c0_53], %51 {strides = array<i32>} : memref<4x8x8xf32, #tpu.memory_space<vmem>>, vector<4x8x8xf32>,
    } else {
    }
    %c0 = arith.constant 0 : index
    %c0_1 = arith.constant 0 : index
    %c0_2 = arith.constant 0 : index
    %c0_3 = arith.constant 0 : index
    %3 = vector.load %arg3[%c0, %c0_1, %c0_2, %c0_3] : memref<1x4x8x8xbf16, #tpu.memory_space<vmem>>, vector<1x4x8x8xbf16>
    %4 = vector.shape_cast %3 : vector<1x4x8x8xbf16> to vector<4x8x8xbf16>
    %5 = arith.extf %4 : vector<4x8x8xbf16> to vector<4x8x8xf32>
    %cst = arith.constant 0.353553385 : f32
    %6 = vector.broadcast %cst : f32 to vector<4x8x8xf32>
    %7 = arith.mulf %5, %6 : vector<4x8x8xf32>
    %8 = arith.truncf %7 : vector<4x8x8xf32> to vector<4x8x8xbf16>
    %c0_4 = arith.constant 0 : index
    %c0_5 = arith.constant 0 : index
    %c0_6 = arith.constant 0 : index
    %c0_7 = arith.constant 0 : index
    %9 = vector.load %arg4[%c0_4, %c0_5, %c0_6, %c0_7] : memref<1x4x8x8xbf16, #tpu.memory_space<vmem>>, vector<1x4x8x8xbf16>
    %10 = vector.shape_cast %9 : vector<1x4x8x8xbf16> to vector<4x8x8xbf16>
    %cst_8 = arith.constant dense<0.000000e+00> : vector<4x8x8xf32>
    %11 = tpu.matmul %8, %10, %cst_8 {dimension_numbers = #tpu.dot_dimension_numbers<[2], [2], [1], [1], [0, 0, 0, 1, 1, 1], [0], [0]>} : vector<4x8x8xbf16>, vector<4x8x8xbf16>, vector<4x8x8xf32> -> vector<4x8x8xf32>
    %c0_9 = arith.constant 0 : index
    %c0_10 = arith.constant 0 : index
    %c0_11 = arith.constant 0 : index
    %12 = vector.load %arg6[%c0_9, %c0_10, %c0_11] : memref<1x8x8xbf16, #tpu.memory_space<vmem>>, vector<1x8x8xbf16>
    %13 = vector.shape_cast %12 : vector<1x8x8xbf16> to vector<8x8xbf16>
    %14 = arith.extf %13 : vector<8x8xbf16> to vector<8x8xf32>
    %15 = vector.shape_cast %14 : vector<8x8xf32> to vector<1x8x8xf32>
    %16 = vector.broadcast %15 : vector<1x8x8xf32> to vector<4x8x8xf32>
    %17 = arith.addf %11, %16 : vector<4x8x8xf32>
    %c0_12 = arith.constant 0 : index
    %c0_13 = arith.constant 0 : index
    %c0_14 = arith.constant 0 : index
    %18 = vector.load %arg8[%c0_12, %c0_13, %c0_14] : memref<4x8x1xf32, #tpu.memory_space<vmem>>, vector<4x8x1xf32>
    %cst_15 = arith.constant dense<0xFF800000> : vector<4x8xf32>
    %19 = vector.multi_reduction <maximumf>, %17, %cst_15 [2] : vector<4x8x8xf32> to vector<4x8xf32>
    %20 = vector.shape_cast %19 : vector<4x8xf32> to vector<4x8x1xf32>
    %21 = arith.maximumf %18, %20 : vector<4x8x1xf32>
    %c0_16 = arith.constant 0 : index
    %c0_17 = arith.constant 0 : index
    %c0_18 = arith.constant 0 : index
    %22 = vector.load %arg8[%c0_16, %c0_17, %c0_18] : memref<4x8x1xf32, #tpu.memory_space<vmem>>, vector<4x8x1xf32>
    %23 = arith.subf %22, %21 : vector<4x8x1xf32>
    %24 = math.exp %23 : vector<4x8x1xf32>
    %25 = vector.broadcast %21 : vector<4x8x1xf32> to vector<4x8x8xf32>
    %26 = arith.subf %17, %25 : vector<4x8x8xf32>
    %27 = math.exp %26 : vector<4x8x8xf32>
    %c0_19 = arith.constant 0 : index
    %c0_20 = arith.constant 0 : index
    %c0_21 = arith.constant 0 : index
    %28 = vector.load %arg9[%c0_19, %c0_20, %c0_21] : memref<4x8x1xf32, #tpu.memory_space<vmem>>, vector<4x8x1xf32>
    %29 = arith.mulf %24, %28 : vector<4x8x1xf32>
    %cst_22 = arith.constant dense<0.000000e+00> : vector<4x8xf32>
    %30 = vector.multi_reduction <add>, %27, %cst_22 [2] : vector<4x8x8xf32> to vector<4x8xf32>
    %31 = vector.shape_cast %30 : vector<4x8xf32> to vector<4x8x1xf32>
    %32 = arith.addf %29, %31 : vector<4x8x1xf32>
    %c0_23 = arith.constant 0 : index
    %c0_24 = arith.constant 0 : index
    %c0_25 = arith.constant 0 : index
    %33 = vector.load %arg9[%c0_23, %c0_24, %c0_25] : memref<4x8x1xf32, #tpu.memory_space<vmem>>, vector<4x8x1xf32>
    tpu.vector_store %arg9[%c0_23, %c0_24, %c0_25], %32 {strides = array<i32>} : memref<4x8x1xf32, #tpu.memory_space<vmem>>, vector<4x8x1xf32>,
    %c0_26 = arith.constant 0 : index
    %c0_27 = arith.constant 0 : index
    %c0_28 = arith.constant 0 : index
    %34 = vector.load %arg10[%c0_26, %c0_27, %c0_28] : memref<4x8x8xf32, #tpu.memory_space<vmem>>, vector<4x8x8xf32>
    %35 = vector.broadcast %24 : vector<4x8x1xf32> to vector<4x8x8xf32>
    %36 = arith.mulf %35, %34 : vector<4x8x8xf32>
    %37 = arith.truncf %27 : vector<4x8x8xf32> to vector<4x8x8xbf16>
    %c0_29 = arith.constant 0 : index
    %c0_30 = arith.constant 0 : index
    %c0_31 = arith.constant 0 : index
    %c0_32 = arith.constant 0 : index
    %38 = vector.load %arg5[%c0_29, %c0_30, %c0_31, %c0_32] : memref<1x4x8x8xbf16, #tpu.memory_space<vmem>>, vector<1x4x8x8xbf16>
    %39 = vector.shape_cast %38 : vector<1x4x8x8xbf16> to vector<4x8x8xbf16>
    %cst_33 = arith.constant dense<0.000000e+00> : vector<4x8x8xf32>
    %40 = tpu.matmul %37, %39, %cst_33 {dimension_numbers = #tpu.dot_dimension_numbers<[2], [1], [1], [2], [0, 0, 0, 1, 1, 2], [0], [0]>} : vector<4x8x8xbf16>, vector<4x8x8xbf16>, vector<4x8x8xf32> -> vector<4x8x8xf32>
    %41 = arith.addf %36, %40 : vector<4x8x8xf32>
    %c0_34 = arith.constant 0 : index
    %c0_35 = arith.constant 0 : index
    %c0_36 = arith.constant 0 : index
    %42 = vector.load %arg10[%c0_34, %c0_35, %c0_36] : memref<4x8x8xf32, #tpu.memory_space<vmem>>, vector<4x8x8xf32>
    tpu.vector_store %arg10[%c0_34, %c0_35, %c0_36], %41 {strides = array<i32>} : memref<4x8x8xf32, #tpu.memory_space<vmem>>, vector<4x8x8xf32>,
    %c0_37 = arith.constant 0 : index
    %c0_38 = arith.constant 0 : index
    %c0_39 = arith.constant 0 : index
    %43 = vector.load %arg8[%c0_37, %c0_38, %c0_39] : memref<4x8x1xf32, #tpu.memory_space<vmem>>, vector<4x8x1xf32>
    tpu.vector_store %arg8[%c0_37, %c0_38, %c0_39], %21 {strides = array<i32>} : memref<4x8x1xf32, #tpu.memory_space<vmem>>, vector<4x8x1xf32>,
    %c0_i32_40 = arith.constant 0 : i32
    %44 = arith.cmpi eq, %arg2, %c0_i32_40 : i32
    %45 = arith.extui %44 : i1 to i32
    %c0_i32_41 = arith.constant 0 : i32
    %46 = arith.cmpi ne, %45, %c0_i32_41 : i32
    scf.if %46 {
      %c0_42 = arith.constant 0 : index
      %c0_43 = arith.constant 0 : index
      %c0_44 = arith.constant 0 : index
      %47 = vector.load %arg10[%c0_42, %c0_43, %c0_44] : memref<4x8x8xf32, #tpu.memory_space<vmem>>, vector<4x8x8xf32>
      %c0_45 = arith.constant 0 : index
      %c0_46 = arith.constant 0 : index
      %c0_47 = arith.constant 0 : index
      %48 = vector.load %arg9[%c0_45, %c0_46, %c0_47] : memref<4x8x1xf32, #tpu.memory_space<vmem>>, vector<4x8x1xf32>
      %49 = tpu.reciprocal %48 {approx = true} : vector<4x8x1xf32> -> vector<4x8x1xf32>
      %50 = vector.broadcast %49 : vector<4x8x1xf32> to vector<4x8x8xf32>
      %51 = arith.mulf %47, %50 : vector<4x8x8xf32>
      %52 = arith.truncf %51 : vector<4x8x8xf32> to vector<4x8x8xbf16>
      %c0_48 = arith.constant 0 : index
      %c0_49 = arith.constant 0 : index
      %c0_50 = arith.constant 0 : index
      %c0_51 = arith.constant 0 : index
      %53 = vector.load %arg7[%c0_48, %c0_49, %c0_50, %c0_51] : memref<1x4x8x8xbf16, #tpu.memory_space<vmem>>, vector<1x4x8x8xbf16>
      %54 = vector.shape_cast %53 : vector<1x4x8x8xbf16> to vector<4x8x8xbf16>
      %55 = vector.shape_cast %52 : vector<4x8x8xbf16> to vector<1x4x8x8xbf16>
      tpu.vector_store %arg7[%c0_48, %c0_49, %c0_50, %c0_51], %55 {strides = array<i32>} : memref<1x4x8x8xbf16, #tpu.memory_space<vmem>>, vector<1x4x8x8xbf16>,
    } else {
    }
    return
  }
  func.func @transform_0(%arg0: i32, %arg1: i32, %arg2: i32) -> (i32, i32, i32, i32) {
    %c0_i32 = arith.constant 0 : i32
    %c0_i32_0 = arith.constant 0 : i32
    %c0_i32_1 = arith.constant 0 : i32
    return %arg0, %c0_i32, %arg1, %c0_i32_0 : i32, i32, i32, i32
  }
  func.func @transform_1(%arg0: i32, %arg1: i32, %arg2: i32) -> (i32, i32, i32, i32) {
    %c0_i32 = arith.constant 0 : i32
    %c0_i32_0 = arith.constant 0 : i32
    %c0_i32_1 = arith.constant 0 : i32
    return %arg0, %c0_i32, %arg2, %c0_i32_0 : i32, i32, i32, i32
  }
  func.func @transform_2(%arg0: i32, %arg1: i32, %arg2: i32) -> (i32, i32, i32, i32) {
    %c0_i32 = arith.constant 0 : i32
    %c0_i32_0 = arith.constant 0 : i32
    %c0_i32_1 = arith.constant 0 : i32
    return %arg0, %c0_i32, %arg2, %c0_i32_0 : i32, i32, i32, i32
  }
  func.func @transform_3(%arg0: i32, %arg1: i32, %arg2: i32) -> (i32, i32, i32) {
    %c0_i32 = arith.constant 0 : i32
    return %arg0, %arg1, %arg2 : i32, i32, i32
  }
  func.func @transform_4(%arg0: i32, %arg1: i32, %arg2: i32) -> (i32, i32, i32, i32) {
    %c0_i32 = arith.constant 0 : i32
    %c0_i32_0 = arith.constant 0 : i32
    %c0_i32_1 = arith.constant 0 : i32
    return %arg0, %c0_i32, %arg1, %c0_i32_0 : i32, i32, i32, i32
  }
}

module attributes {stable_mosaic.version = 11 : i64} {
  func.func @_matmul_bias_res_ln_kernel(%arg0: i32, %arg1: i32, %arg2: memref<16x32xbf16, #tpu.memory_space<vmem>>, %arg3: memref<32x32xbf16, #tpu.memory_space<vmem>>, %arg4: memref<1x32xf32, #tpu.memory_space<vmem>>, %arg5: memref<16x32xbf16, #tpu.memory_space<vmem>>, %arg6: memref<1x32xf32, #tpu.memory_space<vmem>>, %arg7: memref<1x32xf32, #tpu.memory_space<vmem>>, %arg8: memref<16x32xbf16, #tpu.memory_space<vmem>>, %arg9: memref<16x32xf32, #tpu.memory_space<vmem>>) attributes {dimension_semantics = [#tpu.dimension_semantics<parallel>, #tpu.dimension_semantics<arbitrary>], iteration_bounds = array<i64: 1, 1>, scalar_prefetch = 0 : i64, scratch_operands = 1 : i64, tpu.core_type = #tpu.core_type<tc>, window_params = [{transform_indices = @transform_0, window_bounds = array<i64: 16, 32>}, {transform_indices = @transform_1, window_bounds = array<i64: 32, 32>}, {pipeline_mode = #tpu.pipeline_mode<synchronous>, transform_indices = @transform_2, window_bounds = array<i64: 1, 32>}, {transform_indices = @transform_3, window_bounds = array<i64: 16, 32>}, {pipeline_mode = #tpu.pipeline_mode<synchronous>, transform_indices = @transform_4, window_bounds = array<i64: 1, 32>}, {pipeline_mode = #tpu.pipeline_mode<synchronous>, transform_indices = @transform_5, window_bounds = array<i64: 1, 32>}, {transform_indices = @transform_6, window_bounds = array<i64: 16, 32>}]} {
    %c0_i32 = arith.constant 0 : i32
    %0 = arith.cmpi eq, %arg1, %c0_i32 : i32
    %1 = arith.extui %0 : i1 to i32
    %c0_i32_0 = arith.constant 0 : i32
    %2 = arith.cmpi ne, %1, %c0_i32_0 : i32
    scf.if %2 {
      %cst_10 = arith.constant 0.000000e+00 : f32
      %12 = vector.broadcast %cst_10 : f32 to vector<16x32xf32>
      %c0_11 = arith.constant 0 : index
      %c0_12 = arith.constant 0 : index
      %13 = vector.load %arg9[%c0_11, %c0_12] : memref<16x32xf32, #tpu.memory_space<vmem>>, vector<16x32xf32>
      tpu.vector_store %arg9[%c0_11, %c0_12], %12 {strides = array<i32>} : memref<16x32xf32, #tpu.memory_space<vmem>>, vector<16x32xf32>,
    } else {
    }
    %c0 = arith.constant 0 : index
    %c0_1 = arith.constant 0 : index
    %3 = vector.load %arg9[%c0, %c0_1] : memref<16x32xf32, #tpu.memory_space<vmem>>, vector<16x32xf32>
    %c0_2 = arith.constant 0 : index
    %c0_3 = arith.constant 0 : index
    %4 = vector.load %arg2[%c0_2, %c0_3] : memref<16x32xbf16, #tpu.memory_space<vmem>>, vector<16x32xbf16>
    %c0_4 = arith.constant 0 : index
    %c0_5 = arith.constant 0 : index
    %5 = vector.load %arg3[%c0_4, %c0_5] : memref<32x32xbf16, #tpu.memory_space<vmem>>, vector<32x32xbf16>
    %cst = arith.constant dense<0.000000e+00> : vector<16x32xf32>
    %6 = tpu.matmul %4, %5, %cst {dimension_numbers = #tpu.dot_dimension_numbers<[1], [0], [0], [1], [0, 0, 1, 1], [], []>} : vector<16x32xbf16>, vector<32x32xbf16>, vector<16x32xf32> -> vector<16x32xf32>
    %7 = arith.addf %3, %6 : vector<16x32xf32>
    %c0_6 = arith.constant 0 : index
    %c0_7 = arith.constant 0 : index
    %8 = vector.load %arg9[%c0_6, %c0_7] : memref<16x32xf32, #tpu.memory_space<vmem>>, vector<16x32xf32>
    tpu.vector_store %arg9[%c0_6, %c0_7], %7 {strides = array<i32>} : memref<16x32xf32, #tpu.memory_space<vmem>>, vector<16x32xf32>,
    %c0_i32_8 = arith.constant 0 : i32
    %9 = arith.cmpi eq, %arg1, %c0_i32_8 : i32
    %10 = arith.extui %9 : i1 to i32
    %c0_i32_9 = arith.constant 0 : i32
    %11 = arith.cmpi ne, %10, %c0_i32_9 : i32
    scf.if %11 {
      %c0_10 = arith.constant 0 : index
      %c0_11 = arith.constant 0 : index
      %12 = vector.load %arg9[%c0_10, %c0_11] : memref<16x32xf32, #tpu.memory_space<vmem>>, vector<16x32xf32>
      %c0_12 = arith.constant 0 : index
      %c0_13 = arith.constant 0 : index
      %13 = vector.load %arg4[%c0_12, %c0_13] : memref<1x32xf32, #tpu.memory_space<vmem>>, vector<1x32xf32>
      %14 = vector.broadcast %13 : vector<1x32xf32> to vector<16x32xf32>
      %15 = arith.addf %12, %14 : vector<16x32xf32>
      %c0_14 = arith.constant 0 : index
      %c0_15 = arith.constant 0 : index
      %16 = vector.load %arg5[%c0_14, %c0_15] : memref<16x32xbf16, #tpu.memory_space<vmem>>, vector<16x32xbf16>
      %17 = arith.extf %16 : vector<16x32xbf16> to vector<16x32xf32>
      %18 = arith.addf %15, %17 : vector<16x32xf32>
      %cst_16 = arith.constant dense<0.000000e+00> : vector<16xf32>
      %19 = vector.multi_reduction <add>, %18, %cst_16 [1] : vector<16x32xf32> to vector<16xf32>
      %20 = vector.shape_cast %19 : vector<16xf32> to vector<16x1xf32>
      %cst_17 = arith.constant 3.200000e+01 : f32
      %21 = vector.broadcast %cst_17 : f32 to vector<16x1xf32>
      %22 = arith.divf %20, %21 : vector<16x1xf32>
      %23 = vector.broadcast %22 : vector<16x1xf32> to vector<16x32xf32>
      %24 = arith.subf %18, %23 : vector<16x32xf32>
      %25 = arith.mulf %24, %24 : vector<16x32xf32>
      %cst_18 = arith.constant dense<0.000000e+00> : vector<16xf32>
      %26 = vector.multi_reduction <add>, %25, %cst_18 [1] : vector<16x32xf32> to vector<16xf32>
      %27 = vector.shape_cast %26 : vector<16xf32> to vector<16x1xf32>
      %cst_19 = arith.constant 3.200000e+01 : f32
      %28 = vector.broadcast %cst_19 : f32 to vector<16x1xf32>
      %29 = arith.divf %27, %28 : vector<16x1xf32>
      %30 = vector.broadcast %22 : vector<16x1xf32> to vector<16x32xf32>
      %31 = arith.subf %18, %30 : vector<16x32xf32>
      %cst_20 = arith.constant 9.99999974E-6 : f32
      %32 = vector.broadcast %cst_20 : f32 to vector<16x1xf32>
      %33 = arith.addf %29, %32 : vector<16x1xf32>
      %34 = math.rsqrt %33 : vector<16x1xf32>
      %35 = vector.broadcast %34 : vector<16x1xf32> to vector<16x32xf32>
      %36 = arith.mulf %31, %35 : vector<16x32xf32>
      %c0_21 = arith.constant 0 : index
      %c0_22 = arith.constant 0 : index
      %37 = vector.load %arg6[%c0_21, %c0_22] : memref<1x32xf32, #tpu.memory_space<vmem>>, vector<1x32xf32>
      %38 = vector.broadcast %37 : vector<1x32xf32> to vector<16x32xf32>
      %39 = arith.mulf %36, %38 : vector<16x32xf32>
      %c0_23 = arith.constant 0 : index
      %c0_24 = arith.constant 0 : index
      %40 = vector.load %arg7[%c0_23, %c0_24] : memref<1x32xf32, #tpu.memory_space<vmem>>, vector<1x32xf32>
      %41 = vector.broadcast %40 : vector<1x32xf32> to vector<16x32xf32>
      %42 = arith.addf %39, %41 : vector<16x32xf32>
      %43 = arith.truncf %42 : vector<16x32xf32> to vector<16x32xbf16>
      %c0_25 = arith.constant 0 : index
      %c0_26 = arith.constant 0 : index
      %44 = vector.load %arg8[%c0_25, %c0_26] : memref<16x32xbf16, #tpu.memory_space<vmem>>, vector<16x32xbf16>
      tpu.vector_store %arg8[%c0_25, %c0_26], %43 {strides = array<i32>} : memref<16x32xbf16, #tpu.memory_space<vmem>>, vector<16x32xbf16>,
    } else {
    }
    return
  }
  func.func @transform_0(%arg0: i32, %arg1: i32) -> (i32, i32) {
    %c0_i32 = arith.constant 0 : i32
    return %arg0, %arg1 : i32, i32
  }
  func.func @transform_1(%arg0: i32, %arg1: i32) -> (i32, i32) {
    %c0_i32 = arith.constant 0 : i32
    %c0_i32_0 = arith.constant 0 : i32
    return %arg1, %c0_i32 : i32, i32
  }
  func.func @transform_2(%arg0: i32, %arg1: i32) -> (i32, i32) {
    %c0_i32 = arith.constant 0 : i32
    %c0_i32_0 = arith.constant 0 : i32
    %c0_i32_1 = arith.constant 0 : i32
    return %c0_i32, %c0_i32_0 : i32, i32
  }
  func.func @transform_3(%arg0: i32, %arg1: i32) -> (i32, i32) {
    %c0_i32 = arith.constant 0 : i32
    %c0_i32_0 = arith.constant 0 : i32
    return %arg0, %c0_i32 : i32, i32
  }
  func.func @transform_4(%arg0: i32, %arg1: i32) -> (i32, i32) {
    %c0_i32 = arith.constant 0 : i32
    %c0_i32_0 = arith.constant 0 : i32
    %c0_i32_1 = arith.constant 0 : i32
    return %c0_i32, %c0_i32_0 : i32, i32
  }
  func.func @transform_5(%arg0: i32, %arg1: i32) -> (i32, i32) {
    %c0_i32 = arith.constant 0 : i32
    %c0_i32_0 = arith.constant 0 : i32
    %c0_i32_1 = arith.constant 0 : i32
    return %c0_i32, %c0_i32_0 : i32, i32
  }
  func.func @transform_6(%arg0: i32, %arg1: i32) -> (i32, i32) {
    %c0_i32 = arith.constant 0 : i32
    %c0_i32_0 = arith.constant 0 : i32
    return %arg0, %c0_i32 : i32, i32
  }
}

module attributes {stable_mosaic.version = 11 : i64} {
  func.func @_matmul_bias_kernel(%arg0: i32, %arg1: i32, %arg2: i32, %arg3: memref<16x32xbf16, #tpu.memory_space<vmem>>, %arg4: memref<32x32xbf16, #tpu.memory_space<vmem>>, %arg5: memref<1x32xf32, #tpu.memory_space<vmem>>, %arg6: memref<16x32xbf16, #tpu.memory_space<vmem>>, %arg7: memref<16x32xf32, #tpu.memory_space<vmem>>) attributes {dimension_semantics = [#tpu.dimension_semantics<parallel>, #tpu.dimension_semantics<parallel>, #tpu.dimension_semantics<arbitrary>], iteration_bounds = array<i64: 1, 1, 1>, scalar_prefetch = 0 : i64, scratch_operands = 1 : i64, tpu.core_type = #tpu.core_type<tc>, window_params = [{transform_indices = @transform_0, window_bounds = array<i64: 16, 32>}, {transform_indices = @transform_1, window_bounds = array<i64: 32, 32>}, {transform_indices = @transform_2, window_bounds = array<i64: 1, 32>}, {transform_indices = @transform_3, window_bounds = array<i64: 16, 32>}]} {
    %c0_i32 = arith.constant 0 : i32
    %0 = arith.cmpi eq, %arg2, %c0_i32 : i32
    %1 = arith.extui %0 : i1 to i32
    %c0_i32_0 = arith.constant 0 : i32
    %2 = arith.cmpi ne, %1, %c0_i32_0 : i32
    scf.if %2 {
      %cst_10 = arith.constant 0.000000e+00 : f32
      %12 = vector.broadcast %cst_10 : f32 to vector<16x32xf32>
      %c0_11 = arith.constant 0 : index
      %c0_12 = arith.constant 0 : index
      %13 = vector.load %arg7[%c0_11, %c0_12] : memref<16x32xf32, #tpu.memory_space<vmem>>, vector<16x32xf32>
      tpu.vector_store %arg7[%c0_11, %c0_12], %12 {strides = array<i32>} : memref<16x32xf32, #tpu.memory_space<vmem>>, vector<16x32xf32>,
    } else {
    }
    %c0 = arith.constant 0 : index
    %c0_1 = arith.constant 0 : index
    %3 = vector.load %arg7[%c0, %c0_1] : memref<16x32xf32, #tpu.memory_space<vmem>>, vector<16x32xf32>
    %c0_2 = arith.constant 0 : index
    %c0_3 = arith.constant 0 : index
    %4 = vector.load %arg3[%c0_2, %c0_3] : memref<16x32xbf16, #tpu.memory_space<vmem>>, vector<16x32xbf16>
    %c0_4 = arith.constant 0 : index
    %c0_5 = arith.constant 0 : index
    %5 = vector.load %arg4[%c0_4, %c0_5] : memref<32x32xbf16, #tpu.memory_space<vmem>>, vector<32x32xbf16>
    %cst = arith.constant dense<0.000000e+00> : vector<16x32xf32>
    %6 = tpu.matmul %4, %5, %cst {dimension_numbers = #tpu.dot_dimension_numbers<[1], [0], [0], [1], [0, 0, 1, 1], [], []>} : vector<16x32xbf16>, vector<32x32xbf16>, vector<16x32xf32> -> vector<16x32xf32>
    %7 = arith.addf %3, %6 : vector<16x32xf32>
    %c0_6 = arith.constant 0 : index
    %c0_7 = arith.constant 0 : index
    %8 = vector.load %arg7[%c0_6, %c0_7] : memref<16x32xf32, #tpu.memory_space<vmem>>, vector<16x32xf32>
    tpu.vector_store %arg7[%c0_6, %c0_7], %7 {strides = array<i32>} : memref<16x32xf32, #tpu.memory_space<vmem>>, vector<16x32xf32>,
    %c0_i32_8 = arith.constant 0 : i32
    %9 = arith.cmpi eq, %arg2, %c0_i32_8 : i32
    %10 = arith.extui %9 : i1 to i32
    %c0_i32_9 = arith.constant 0 : i32
    %11 = arith.cmpi ne, %10, %c0_i32_9 : i32
    scf.if %11 {
      %c0_10 = arith.constant 0 : index
      %c0_11 = arith.constant 0 : index
      %12 = vector.load %arg7[%c0_10, %c0_11] : memref<16x32xf32, #tpu.memory_space<vmem>>, vector<16x32xf32>
      %c0_12 = arith.constant 0 : index
      %c0_13 = arith.constant 0 : index
      %13 = vector.load %arg5[%c0_12, %c0_13] : memref<1x32xf32, #tpu.memory_space<vmem>>, vector<1x32xf32>
      %14 = vector.broadcast %13 : vector<1x32xf32> to vector<16x32xf32>
      %15 = arith.addf %12, %14 : vector<16x32xf32>
      %16 = arith.truncf %15 : vector<16x32xf32> to vector<16x32xbf16>
      %c0_14 = arith.constant 0 : index
      %c0_15 = arith.constant 0 : index
      %17 = vector.load %arg6[%c0_14, %c0_15] : memref<16x32xbf16, #tpu.memory_space<vmem>>, vector<16x32xbf16>
      tpu.vector_store %arg6[%c0_14, %c0_15], %16 {strides = array<i32>} : memref<16x32xbf16, #tpu.memory_space<vmem>>, vector<16x32xbf16>,
    } else {
    }
    return
  }
  func.func @transform_0(%arg0: i32, %arg1: i32, %arg2: i32) -> (i32, i32) {
    %c0_i32 = arith.constant 0 : i32
    return %arg0, %arg2 : i32, i32
  }
  func.func @transform_1(%arg0: i32, %arg1: i32, %arg2: i32) -> (i32, i32) {
    %c0_i32 = arith.constant 0 : i32
    return %arg2, %arg1 : i32, i32
  }
  func.func @transform_2(%arg0: i32, %arg1: i32, %arg2: i32) -> (i32, i32) {
    %c0_i32 = arith.constant 0 : i32
    %c0_i32_0 = arith.constant 0 : i32
    return %c0_i32, %arg1 : i32, i32
  }
  func.func @transform_3(%arg0: i32, %arg1: i32, %arg2: i32) -> (i32, i32) {
    %c0_i32 = arith.constant 0 : i32
    return %arg0, %arg1 : i32, i32
  }
}

module attributes {stable_mosaic.version = 11 : i64} {
  func.func @_matmul_bias_kernel(%arg0: i32, %arg1: i32, %arg2: i32, %arg3: memref<16x32xbf16, #tpu.memory_space<vmem>>, %arg4: memref<32x64xbf16, #tpu.memory_space<vmem>>, %arg5: memref<1x64xf32, #tpu.memory_space<vmem>>, %arg6: memref<16x64xbf16, #tpu.memory_space<vmem>>, %arg7: memref<16x64xf32, #tpu.memory_space<vmem>>) attributes {dimension_semantics = [#tpu.dimension_semantics<parallel>, #tpu.dimension_semantics<parallel>, #tpu.dimension_semantics<arbitrary>], iteration_bounds = array<i64: 1, 1, 1>, scalar_prefetch = 0 : i64, scratch_operands = 1 : i64, tpu.core_type = #tpu.core_type<tc>, window_params = [{transform_indices = @transform_0, window_bounds = array<i64: 16, 32>}, {transform_indices = @transform_1, window_bounds = array<i64: 32, 64>}, {transform_indices = @transform_2, window_bounds = array<i64: 1, 64>}, {transform_indices = @transform_3, window_bounds = array<i64: 16, 64>}]} {
    %c0_i32 = arith.constant 0 : i32
    %0 = arith.cmpi eq, %arg2, %c0_i32 : i32
    %1 = arith.extui %0 : i1 to i32
    %c0_i32_0 = arith.constant 0 : i32
    %2 = arith.cmpi ne, %1, %c0_i32_0 : i32
    scf.if %2 {
      %cst_10 = arith.constant 0.000000e+00 : f32
      %12 = vector.broadcast %cst_10 : f32 to vector<16x64xf32>
      %c0_11 = arith.constant 0 : index
      %c0_12 = arith.constant 0 : index
      %13 = vector.load %arg7[%c0_11, %c0_12] : memref<16x64xf32, #tpu.memory_space<vmem>>, vector<16x64xf32>
      tpu.vector_store %arg7[%c0_11, %c0_12], %12 {strides = array<i32>} : memref<16x64xf32, #tpu.memory_space<vmem>>, vector<16x64xf32>,
    } else {
    }
    %c0 = arith.constant 0 : index
    %c0_1 = arith.constant 0 : index
    %3 = vector.load %arg7[%c0, %c0_1] : memref<16x64xf32, #tpu.memory_space<vmem>>, vector<16x64xf32>
    %c0_2 = arith.constant 0 : index
    %c0_3 = arith.constant 0 : index
    %4 = vector.load %arg3[%c0_2, %c0_3] : memref<16x32xbf16, #tpu.memory_space<vmem>>, vector<16x32xbf16>
    %c0_4 = arith.constant 0 : index
    %c0_5 = arith.constant 0 : index
    %5 = vector.load %arg4[%c0_4, %c0_5] : memref<32x64xbf16, #tpu.memory_space<vmem>>, vector<32x64xbf16>
    %cst = arith.constant dense<0.000000e+00> : vector<16x64xf32>
    %6 = tpu.matmul %4, %5, %cst {dimension_numbers = #tpu.dot_dimension_numbers<[1], [0], [0], [1], [0, 0, 1, 1], [], []>} : vector<16x32xbf16>, vector<32x64xbf16>, vector<16x64xf32> -> vector<16x64xf32>
    %7 = arith.addf %3, %6 : vector<16x64xf32>
    %c0_6 = arith.constant 0 : index
    %c0_7 = arith.constant 0 : index
    %8 = vector.load %arg7[%c0_6, %c0_7] : memref<16x64xf32, #tpu.memory_space<vmem>>, vector<16x64xf32>
    tpu.vector_store %arg7[%c0_6, %c0_7], %7 {strides = array<i32>} : memref<16x64xf32, #tpu.memory_space<vmem>>, vector<16x64xf32>,
    %c0_i32_8 = arith.constant 0 : i32
    %9 = arith.cmpi eq, %arg2, %c0_i32_8 : i32
    %10 = arith.extui %9 : i1 to i32
    %c0_i32_9 = arith.constant 0 : i32
    %11 = arith.cmpi ne, %10, %c0_i32_9 : i32
    scf.if %11 {
      %c0_10 = arith.constant 0 : index
      %c0_11 = arith.constant 0 : index
      %12 = vector.load %arg7[%c0_10, %c0_11] : memref<16x64xf32, #tpu.memory_space<vmem>>, vector<16x64xf32>
      %c0_12 = arith.constant 0 : index
      %c0_13 = arith.constant 0 : index
      %13 = vector.load %arg5[%c0_12, %c0_13] : memref<1x64xf32, #tpu.memory_space<vmem>>, vector<1x64xf32>
      %14 = vector.broadcast %13 : vector<1x64xf32> to vector<16x64xf32>
      %15 = arith.addf %12, %14 : vector<16x64xf32>
      %16 = arith.truncf %15 : vector<16x64xf32> to vector<16x64xbf16>
      %c0_14 = arith.constant 0 : index
      %c0_15 = arith.constant 0 : index
      %17 = vector.load %arg6[%c0_14, %c0_15] : memref<16x64xbf16, #tpu.memory_space<vmem>>, vector<16x64xbf16>
      tpu.vector_store %arg6[%c0_14, %c0_15], %16 {strides = array<i32>} : memref<16x64xbf16, #tpu.memory_space<vmem>>, vector<16x64xbf16>,
    } else {
    }
    return
  }
  func.func @transform_0(%arg0: i32, %arg1: i32, %arg2: i32) -> (i32, i32) {
    %c0_i32 = arith.constant 0 : i32
    return %arg0, %arg2 : i32, i32
  }
  func.func @transform_1(%arg0: i32, %arg1: i32, %arg2: i32) -> (i32, i32) {
    %c0_i32 = arith.constant 0 : i32
    return %arg2, %arg1 : i32, i32
  }
  func.func @transform_2(%arg0: i32, %arg1: i32, %arg2: i32) -> (i32, i32) {
    %c0_i32 = arith.constant 0 : i32
    %c0_i32_0 = arith.constant 0 : i32
    return %c0_i32, %arg1 : i32, i32
  }
  func.func @transform_3(%arg0: i32, %arg1: i32, %arg2: i32) -> (i32, i32) {
    %c0_i32 = arith.constant 0 : i32
    return %arg0, %arg1 : i32, i32
  }
}

module attributes {stable_mosaic.version = 11 : i64} {
  func.func @_matmul_bias_kernel(%arg0: i32, %arg1: i32, %arg2: i32, %arg3: memref<16x32xbf16, #tpu.memory_space<vmem>>, %arg4: memref<32x64xbf16, #tpu.memory_space<vmem>>, %arg5: memref<1x64xf32, #tpu.memory_space<vmem>>, %arg6: memref<16x64xbf16, #tpu.memory_space<vmem>>, %arg7: memref<16x64xf32, #tpu.memory_space<vmem>>) attributes {dimension_semantics = [#tpu.dimension_semantics<parallel>, #tpu.dimension_semantics<parallel>, #tpu.dimension_semantics<arbitrary>], iteration_bounds = array<i64: 1, 1, 1>, scalar_prefetch = 0 : i64, scratch_operands = 1 : i64, tpu.core_type = #tpu.core_type<tc>, window_params = [{transform_indices = @transform_0, window_bounds = array<i64: 16, 32>}, {transform_indices = @transform_1, window_bounds = array<i64: 32, 64>}, {transform_indices = @transform_2, window_bounds = array<i64: 1, 64>}, {transform_indices = @transform_3, window_bounds = array<i64: 16, 64>}]} {
    %c0_i32 = arith.constant 0 : i32
    %0 = arith.cmpi eq, %arg2, %c0_i32 : i32
    %1 = arith.extui %0 : i1 to i32
    %c0_i32_0 = arith.constant 0 : i32
    %2 = arith.cmpi ne, %1, %c0_i32_0 : i32
    scf.if %2 {
      %cst_10 = arith.constant 0.000000e+00 : f32
      %12 = vector.broadcast %cst_10 : f32 to vector<16x64xf32>
      %c0_11 = arith.constant 0 : index
      %c0_12 = arith.constant 0 : index
      %13 = vector.load %arg7[%c0_11, %c0_12] : memref<16x64xf32, #tpu.memory_space<vmem>>, vector<16x64xf32>
      tpu.vector_store %arg7[%c0_11, %c0_12], %12 {strides = array<i32>} : memref<16x64xf32, #tpu.memory_space<vmem>>, vector<16x64xf32>,
    } else {
    }
    %c0 = arith.constant 0 : index
    %c0_1 = arith.constant 0 : index
    %3 = vector.load %arg7[%c0, %c0_1] : memref<16x64xf32, #tpu.memory_space<vmem>>, vector<16x64xf32>
    %c0_2 = arith.constant 0 : index
    %c0_3 = arith.constant 0 : index
    %4 = vector.load %arg3[%c0_2, %c0_3] : memref<16x32xbf16, #tpu.memory_space<vmem>>, vector<16x32xbf16>
    %c0_4 = arith.constant 0 : index
    %c0_5 = arith.constant 0 : index
    %5 = vector.load %arg4[%c0_4, %c0_5] : memref<32x64xbf16, #tpu.memory_space<vmem>>, vector<32x64xbf16>
    %cst = arith.constant dense<0.000000e+00> : vector<16x64xf32>
    %6 = tpu.matmul %4, %5, %cst {dimension_numbers = #tpu.dot_dimension_numbers<[1], [0], [0], [1], [0, 0, 1, 1], [], []>} : vector<16x32xbf16>, vector<32x64xbf16>, vector<16x64xf32> -> vector<16x64xf32>
    %7 = arith.addf %3, %6 : vector<16x64xf32>
    %c0_6 = arith.constant 0 : index
    %c0_7 = arith.constant 0 : index
    %8 = vector.load %arg7[%c0_6, %c0_7] : memref<16x64xf32, #tpu.memory_space<vmem>>, vector<16x64xf32>
    tpu.vector_store %arg7[%c0_6, %c0_7], %7 {strides = array<i32>} : memref<16x64xf32, #tpu.memory_space<vmem>>, vector<16x64xf32>,
    %c0_i32_8 = arith.constant 0 : i32
    %9 = arith.cmpi eq, %arg2, %c0_i32_8 : i32
    %10 = arith.extui %9 : i1 to i32
    %c0_i32_9 = arith.constant 0 : i32
    %11 = arith.cmpi ne, %10, %c0_i32_9 : i32
    scf.if %11 {
      %c0_10 = arith.constant 0 : index
      %c0_11 = arith.constant 0 : index
      %12 = vector.load %arg7[%c0_10, %c0_11] : memref<16x64xf32, #tpu.memory_space<vmem>>, vector<16x64xf32>
      %c0_12 = arith.constant 0 : index
      %c0_13 = arith.constant 0 : index
      %13 = vector.load %arg5[%c0_12, %c0_13] : memref<1x64xf32, #tpu.memory_space<vmem>>, vector<1x64xf32>
      %14 = vector.broadcast %13 : vector<1x64xf32> to vector<16x64xf32>
      %15 = arith.addf %12, %14 : vector<16x64xf32>
      %cst_14 = arith.constant 0.000000e+00 : f32
      %16 = vector.broadcast %cst_14 : f32 to vector<16x64xf32>
      %17 = arith.maximumf %15, %16 : vector<16x64xf32>
      %18 = arith.truncf %17 : vector<16x64xf32> to vector<16x64xbf16>
      %c0_15 = arith.constant 0 : index
      %c0_16 = arith.constant 0 : index
      %19 = vector.load %arg6[%c0_15, %c0_16] : memref<16x64xbf16, #tpu.memory_space<vmem>>, vector<16x64xbf16>
      tpu.vector_store %arg6[%c0_15, %c0_16], %18 {strides = array<i32>} : memref<16x64xbf16, #tpu.memory_space<vmem>>, vector<16x64xbf16>,
    } else {
    }
    return
  }
  func.func @transform_0(%arg0: i32, %arg1: i32, %arg2: i32) -> (i32, i32) {
    %c0_i32 = arith.constant 0 : i32
    return %arg0, %arg2 : i32, i32
  }
  func.func @transform_1(%arg0: i32, %arg1: i32, %arg2: i32) -> (i32, i32) {
    %c0_i32 = arith.constant 0 : i32
    return %arg2, %arg1 : i32, i32
  }
  func.func @transform_2(%arg0: i32, %arg1: i32, %arg2: i32) -> (i32, i32) {
    %c0_i32 = arith.constant 0 : i32
    %c0_i32_0 = arith.constant 0 : i32
    return %c0_i32, %arg1 : i32, i32
  }
  func.func @transform_3(%arg0: i32, %arg1: i32, %arg2: i32) -> (i32, i32) {
    %c0_i32 = arith.constant 0 : i32
    return %arg0, %arg1 : i32, i32
  }
}

module attributes {stable_mosaic.version = 11 : i64} {
  func.func @_matmul_bias_res_ln_kernel(%arg0: i32, %arg1: i32, %arg2: memref<16x64xbf16, #tpu.memory_space<vmem>>, %arg3: memref<64x32xbf16, #tpu.memory_space<vmem>>, %arg4: memref<1x32xf32, #tpu.memory_space<vmem>>, %arg5: memref<16x32xbf16, #tpu.memory_space<vmem>>, %arg6: memref<1x32xf32, #tpu.memory_space<vmem>>, %arg7: memref<1x32xf32, #tpu.memory_space<vmem>>, %arg8: memref<16x32xbf16, #tpu.memory_space<vmem>>, %arg9: memref<16x32xf32, #tpu.memory_space<vmem>>) attributes {dimension_semantics = [#tpu.dimension_semantics<parallel>, #tpu.dimension_semantics<arbitrary>], iteration_bounds = array<i64: 1, 1>, scalar_prefetch = 0 : i64, scratch_operands = 1 : i64, tpu.core_type = #tpu.core_type<tc>, window_params = [{transform_indices = @transform_0, window_bounds = array<i64: 16, 64>}, {transform_indices = @transform_1, window_bounds = array<i64: 64, 32>}, {pipeline_mode = #tpu.pipeline_mode<synchronous>, transform_indices = @transform_2, window_bounds = array<i64: 1, 32>}, {transform_indices = @transform_3, window_bounds = array<i64: 16, 32>}, {pipeline_mode = #tpu.pipeline_mode<synchronous>, transform_indices = @transform_4, window_bounds = array<i64: 1, 32>}, {pipeline_mode = #tpu.pipeline_mode<synchronous>, transform_indices = @transform_5, window_bounds = array<i64: 1, 32>}, {transform_indices = @transform_6, window_bounds = array<i64: 16, 32>}]} {
    %c0_i32 = arith.constant 0 : i32
    %0 = arith.cmpi eq, %arg1, %c0_i32 : i32
    %1 = arith.extui %0 : i1 to i32
    %c0_i32_0 = arith.constant 0 : i32
    %2 = arith.cmpi ne, %1, %c0_i32_0 : i32
    scf.if %2 {
      %cst_10 = arith.constant 0.000000e+00 : f32
      %12 = vector.broadcast %cst_10 : f32 to vector<16x32xf32>
      %c0_11 = arith.constant 0 : index
      %c0_12 = arith.constant 0 : index
      %13 = vector.load %arg9[%c0_11, %c0_12] : memref<16x32xf32, #tpu.memory_space<vmem>>, vector<16x32xf32>
      tpu.vector_store %arg9[%c0_11, %c0_12], %12 {strides = array<i32>} : memref<16x32xf32, #tpu.memory_space<vmem>>, vector<16x32xf32>,
    } else {
    }
    %c0 = arith.constant 0 : index
    %c0_1 = arith.constant 0 : index
    %3 = vector.load %arg9[%c0, %c0_1] : memref<16x32xf32, #tpu.memory_space<vmem>>, vector<16x32xf32>
    %c0_2 = arith.constant 0 : index
    %c0_3 = arith.constant 0 : index
    %4 = vector.load %arg2[%c0_2, %c0_3] : memref<16x64xbf16, #tpu.memory_space<vmem>>, vector<16x64xbf16>
    %c0_4 = arith.constant 0 : index
    %c0_5 = arith.constant 0 : index
    %5 = vector.load %arg3[%c0_4, %c0_5] : memref<64x32xbf16, #tpu.memory_space<vmem>>, vector<64x32xbf16>
    %cst = arith.constant dense<0.000000e+00> : vector<16x32xf32>
    %6 = tpu.matmul %4, %5, %cst {dimension_numbers = #tpu.dot_dimension_numbers<[1], [0], [0], [1], [0, 0, 1, 1], [], []>} : vector<16x64xbf16>, vector<64x32xbf16>, vector<16x32xf32> -> vector<16x32xf32>
    %7 = arith.addf %3, %6 : vector<16x32xf32>
    %c0_6 = arith.constant 0 : index
    %c0_7 = arith.constant 0 : index
    %8 = vector.load %arg9[%c0_6, %c0_7] : memref<16x32xf32, #tpu.memory_space<vmem>>, vector<16x32xf32>
    tpu.vector_store %arg9[%c0_6, %c0_7], %7 {strides = array<i32>} : memref<16x32xf32, #tpu.memory_space<vmem>>, vector<16x32xf32>,
    %c0_i32_8 = arith.constant 0 : i32
    %9 = arith.cmpi eq, %arg1, %c0_i32_8 : i32
    %10 = arith.extui %9 : i1 to i32
    %c0_i32_9 = arith.constant 0 : i32
    %11 = arith.cmpi ne, %10, %c0_i32_9 : i32
    scf.if %11 {
      %c0_10 = arith.constant 0 : index
      %c0_11 = arith.constant 0 : index
      %12 = vector.load %arg9[%c0_10, %c0_11] : memref<16x32xf32, #tpu.memory_space<vmem>>, vector<16x32xf32>
      %c0_12 = arith.constant 0 : index
      %c0_13 = arith.constant 0 : index
      %13 = vector.load %arg4[%c0_12, %c0_13] : memref<1x32xf32, #tpu.memory_space<vmem>>, vector<1x32xf32>
      %14 = vector.broadcast %13 : vector<1x32xf32> to vector<16x32xf32>
      %15 = arith.addf %12, %14 : vector<16x32xf32>
      %c0_14 = arith.constant 0 : index
      %c0_15 = arith.constant 0 : index
      %16 = vector.load %arg5[%c0_14, %c0_15] : memref<16x32xbf16, #tpu.memory_space<vmem>>, vector<16x32xbf16>
      %17 = arith.extf %16 : vector<16x32xbf16> to vector<16x32xf32>
      %18 = arith.addf %15, %17 : vector<16x32xf32>
      %cst_16 = arith.constant dense<0.000000e+00> : vector<16xf32>
      %19 = vector.multi_reduction <add>, %18, %cst_16 [1] : vector<16x32xf32> to vector<16xf32>
      %20 = vector.shape_cast %19 : vector<16xf32> to vector<16x1xf32>
      %cst_17 = arith.constant 3.200000e+01 : f32
      %21 = vector.broadcast %cst_17 : f32 to vector<16x1xf32>
      %22 = arith.divf %20, %21 : vector<16x1xf32>
      %23 = vector.broadcast %22 : vector<16x1xf32> to vector<16x32xf32>
      %24 = arith.subf %18, %23 : vector<16x32xf32>
      %25 = arith.mulf %24, %24 : vector<16x32xf32>
      %cst_18 = arith.constant dense<0.000000e+00> : vector<16xf32>
      %26 = vector.multi_reduction <add>, %25, %cst_18 [1] : vector<16x32xf32> to vector<16xf32>
      %27 = vector.shape_cast %26 : vector<16xf32> to vector<16x1xf32>
      %cst_19 = arith.constant 3.200000e+01 : f32
      %28 = vector.broadcast %cst_19 : f32 to vector<16x1xf32>
      %29 = arith.divf %27, %28 : vector<16x1xf32>
      %30 = vector.broadcast %22 : vector<16x1xf32> to vector<16x32xf32>
      %31 = arith.subf %18, %30 : vector<16x32xf32>
      %cst_20 = arith.constant 9.99999974E-6 : f32
      %32 = vector.broadcast %cst_20 : f32 to vector<16x1xf32>
      %33 = arith.addf %29, %32 : vector<16x1xf32>
      %34 = math.rsqrt %33 : vector<16x1xf32>
      %35 = vector.broadcast %34 : vector<16x1xf32> to vector<16x32xf32>
      %36 = arith.mulf %31, %35 : vector<16x32xf32>
      %c0_21 = arith.constant 0 : index
      %c0_22 = arith.constant 0 : index
      %37 = vector.load %arg6[%c0_21, %c0_22] : memref<1x32xf32, #tpu.memory_space<vmem>>, vector<1x32xf32>
      %38 = vector.broadcast %37 : vector<1x32xf32> to vector<16x32xf32>
      %39 = arith.mulf %36, %38 : vector<16x32xf32>
      %c0_23 = arith.constant 0 : index
      %c0_24 = arith.constant 0 : index
      %40 = vector.load %arg7[%c0_23, %c0_24] : memref<1x32xf32, #tpu.memory_space<vmem>>, vector<1x32xf32>
      %41 = vector.broadcast %40 : vector<1x32xf32> to vector<16x32xf32>
      %42 = arith.addf %39, %41 : vector<16x32xf32>
      %43 = arith.truncf %42 : vector<16x32xf32> to vector<16x32xbf16>
      %c0_25 = arith.constant 0 : index
      %c0_26 = arith.constant 0 : index
      %44 = vector.load %arg8[%c0_25, %c0_26] : memref<16x32xbf16, #tpu.memory_space<vmem>>, vector<16x32xbf16>
      tpu.vector_store %arg8[%c0_25, %c0_26], %43 {strides = array<i32>} : memref<16x32xbf16, #tpu.memory_space<vmem>>, vector<16x32xbf16>,
    } else {
    }
    return
  }
  func.func @transform_0(%arg0: i32, %arg1: i32) -> (i32, i32) {
    %c0_i32 = arith.constant 0 : i32
    return %arg0, %arg1 : i32, i32
  }
  func.func @transform_1(%arg0: i32, %arg1: i32) -> (i32, i32) {
    %c0_i32 = arith.constant 0 : i32
    %c0_i32_0 = arith.constant 0 : i32
    return %arg1, %c0_i32 : i32, i32
  }
  func.func @transform_2(%arg0: i32, %arg1: i32) -> (i32, i32) {
    %c0_i32 = arith.constant 0 : i32
    %c0_i32_0 = arith.constant 0 : i32
    %c0_i32_1 = arith.constant 0 : i32
    return %c0_i32, %c0_i32_0 : i32, i32
  }
  func.func @transform_3(%arg0: i32, %arg1: i32) -> (i32, i32) {
    %c0_i32 = arith.constant 0 : i32
    %c0_i32_0 = arith.constant 0 : i32
    return %arg0, %c0_i32 : i32, i32
  }
  func.func @transform_4(%arg0: i32, %arg1: i32) -> (i32, i32) {
    %c0_i32 = arith.constant 0 : i32
    %c0_i32_0 = arith.constant 0 : i32
    %c0_i32_1 = arith.constant 0 : i32
    return %c0_i32, %c0_i32_0 : i32, i32
  }
  func.func @transform_5(%arg0: i32, %arg1: i32) -> (i32, i32) {
    %c0_i32 = arith.constant 0 : i32
    %c0_i32_0 = arith.constant 0 : i32
    %c0_i32_1 = arith.constant 0 : i32
    return %c0_i32, %c0_i32_0 : i32, i32
  }
  func.func @transform_6(%arg0: i32, %arg1: i32) -> (i32, i32) {
    %c0_i32 = arith.constant 0 : i32
    %c0_i32_0 = arith.constant 0 : i32
    return %arg0, %c0_i32 : i32, i32
  }
}

module attributes {stable_mosaic.version = 11 : i64} {
  func.func @_matmul_bias_kernel(%arg0: i32, %arg1: i32, %arg2: i32, %arg3: memref<16x32xbf16, #tpu.memory_space<vmem>>, %arg4: memref<32x128xbf16, #tpu.memory_space<vmem>>, %arg5: memref<1x128xf32, #tpu.memory_space<vmem>>, %arg6: memref<16x128xf32, #tpu.memory_space<vmem>>, %arg7: memref<16x128xf32, #tpu.memory_space<vmem>>) attributes {dimension_semantics = [#tpu.dimension_semantics<parallel>, #tpu.dimension_semantics<parallel>, #tpu.dimension_semantics<arbitrary>], iteration_bounds = array<i64: 1, 1, 1>, scalar_prefetch = 0 : i64, scratch_operands = 1 : i64, tpu.core_type = #tpu.core_type<tc>, window_params = [{transform_indices = @transform_0, window_bounds = array<i64: 16, 32>}, {transform_indices = @transform_1, window_bounds = array<i64: 32, 128>}, {transform_indices = @transform_2, window_bounds = array<i64: 1, 128>}, {transform_indices = @transform_3, window_bounds = array<i64: 16, 128>}]} {
    %c0_i32 = arith.constant 0 : i32
    %0 = arith.cmpi eq, %arg2, %c0_i32 : i32
    %1 = arith.extui %0 : i1 to i32
    %c0_i32_0 = arith.constant 0 : i32
    %2 = arith.cmpi ne, %1, %c0_i32_0 : i32
    scf.if %2 {
      %cst_10 = arith.constant 0.000000e+00 : f32
      %12 = vector.broadcast %cst_10 : f32 to vector<16x128xf32>
      %c0_11 = arith.constant 0 : index
      %c0_12 = arith.constant 0 : index
      %13 = vector.load %arg7[%c0_11, %c0_12] : memref<16x128xf32, #tpu.memory_space<vmem>>, vector<16x128xf32>
      tpu.vector_store %arg7[%c0_11, %c0_12], %12 {strides = array<i32>} : memref<16x128xf32, #tpu.memory_space<vmem>>, vector<16x128xf32>,
    } else {
    }
    %c0 = arith.constant 0 : index
    %c0_1 = arith.constant 0 : index
    %3 = vector.load %arg7[%c0, %c0_1] : memref<16x128xf32, #tpu.memory_space<vmem>>, vector<16x128xf32>
    %c0_2 = arith.constant 0 : index
    %c0_3 = arith.constant 0 : index
    %4 = vector.load %arg3[%c0_2, %c0_3] : memref<16x32xbf16, #tpu.memory_space<vmem>>, vector<16x32xbf16>
    %c0_4 = arith.constant 0 : index
    %c0_5 = arith.constant 0 : index
    %5 = vector.load %arg4[%c0_4, %c0_5] : memref<32x128xbf16, #tpu.memory_space<vmem>>, vector<32x128xbf16>
    %cst = arith.constant dense<0.000000e+00> : vector<16x128xf32>
    %6 = tpu.matmul %4, %5, %cst {dimension_numbers = #tpu.dot_dimension_numbers<[1], [0], [0], [1], [0, 0, 1, 1], [], []>} : vector<16x32xbf16>, vector<32x128xbf16>, vector<16x128xf32> -> vector<16x128xf32>
    %7 = arith.addf %3, %6 : vector<16x128xf32>
    %c0_6 = arith.constant 0 : index
    %c0_7 = arith.constant 0 : index
    %8 = vector.load %arg7[%c0_6, %c0_7] : memref<16x128xf32, #tpu.memory_space<vmem>>, vector<16x128xf32>
    tpu.vector_store %arg7[%c0_6, %c0_7], %7 {strides = array<i32>} : memref<16x128xf32, #tpu.memory_space<vmem>>, vector<16x128xf32>,
    %c0_i32_8 = arith.constant 0 : i32
    %9 = arith.cmpi eq, %arg2, %c0_i32_8 : i32
    %10 = arith.extui %9 : i1 to i32
    %c0_i32_9 = arith.constant 0 : i32
    %11 = arith.cmpi ne, %10, %c0_i32_9 : i32
    scf.if %11 {
      %c0_10 = arith.constant 0 : index
      %c0_11 = arith.constant 0 : index
      %12 = vector.load %arg7[%c0_10, %c0_11] : memref<16x128xf32, #tpu.memory_space<vmem>>, vector<16x128xf32>
      %c0_12 = arith.constant 0 : index
      %c0_13 = arith.constant 0 : index
      %13 = vector.load %arg5[%c0_12, %c0_13] : memref<1x128xf32, #tpu.memory_space<vmem>>, vector<1x128xf32>
      %14 = vector.broadcast %13 : vector<1x128xf32> to vector<16x128xf32>
      %15 = arith.addf %12, %14 : vector<16x128xf32>
      %c0_14 = arith.constant 0 : index
      %c0_15 = arith.constant 0 : index
      %16 = vector.load %arg6[%c0_14, %c0_15] : memref<16x128xf32, #tpu.memory_space<vmem>>, vector<16x128xf32>
      tpu.vector_store %arg6[%c0_14, %c0_15], %15 {strides = array<i32>} : memref<16x128xf32, #tpu.memory_space<vmem>>, vector<16x128xf32>,
    } else {
    }
    return
  }
  func.func @transform_0(%arg0: i32, %arg1: i32, %arg2: i32) -> (i32, i32) {
    %c0_i32 = arith.constant 0 : i32
    return %arg0, %arg2 : i32, i32
  }
  func.func @transform_1(%arg0: i32, %arg1: i32, %arg2: i32) -> (i32, i32) {
    %c0_i32 = arith.constant 0 : i32
    return %arg2, %arg1 : i32, i32
  }
  func.func @transform_2(%arg0: i32, %arg1: i32, %arg2: i32) -> (i32, i32) {
    %c0_i32 = arith.constant 0 : i32
    %c0_i32_0 = arith.constant 0 : i32
    return %c0_i32, %arg1 : i32, i32
  }
  func.func @transform_3(%arg0: i32, %arg1: i32, %arg2: i32) -> (i32, i32) {
    %c0_i32 = arith.constant 0 : i32
    return %arg0, %arg1 : i32, i32
  }
}

</mosaic_0001>

<bundles_post_ra>
// kernel: squeeze.15
= control target key start
LH: loop header
LB: loop body
LE: loop exit
PB: predicated region body
PF: predicated region fallthrough
CT: control target
= control target key end

     0   :  { %vm35_vm0 = vcmask 64512   ;;  %s279_s8 = smov 104   ;;  %s280_s9 = smov 112   ;;  %v281_v16 = vmov 0.0   ;;  %s359_s0 = inlined_call_operand.vmem [shape: bf16[2,8,32], index: 0, kind: input, shape index: {}]   ;;  %s360_s1 = inlined_call_operand.vmem [shape: bf16[2,8,4,8], index: 1, kind: output, shape index: {}]  }
   0x1   :  { %v256_v0 = vld [vmem:[%s359_s0] sm:$0xff]   ;;  %s278_s0 = smov 120  }
   0x2   :  { %v257_v1 = vunpack.c.l.bf16 %v256_v0  ;;  %v258_v2 = vunpack.c.h.bf16 %v256_v0 }
   0x4   :  { %42 = vst.msk [vmem:[#allocation0 + $0x40] ss:$8 sm:$0xf] %vm35_vm0, %v258_v2   ;;  %44 = vst.msk [vmem:[#allocation0 + $0x40] ss:$8 sm:$0xf0] %vm35_vm0, %v258_v2   ;;  %v263_v3 = vpack.i.bf16 %v258_v2, %v257_v1 }
   0x5   :  { %36 = vst.msk [vmem:[#allocation0] ss:$8 sm:$0xf] %vm35_vm0, %v257_v1   ;;  %37 = vst.msk [vmem:[#allocation0] ss:$8 sm:$0xf0] %vm35_vm0, %v257_v1  }
   0x6   :  { %264 = vrot.lane.b32.xlu0 %v263_v3, %s278_s0  ;;  %274 = vrot.lane.b32.xlu1 %v263_v3, %s279_s8 }
   0xa   :  { %269 = vrot.lane.b32.xlu0 %v263_v3, %s280_s9 }
  0x78   :  { %v265_v4 = vpop.permute.xlu0 %264  ;;  %v275_v5 = vpop.permute.xlu1 %274 }
  0x79   :  { %v267_v6 = vunpack.i.h.bf16 %v265_v4  ;;  %v266_v7 = vunpack.i.l.bf16 %v265_v4  ;;  %v277_v8 = vunpack.i.h.bf16 %v275_v5  ;;  %v276_v9 = vunpack.i.l.bf16 %v275_v5 }
  0x7b   :  { %59 = vst.msk [vmem:[#allocation0 + $0x41] ss:$8 sm:$0xf] %vm35_vm0, %v267_v6   ;;  %61 = vst.msk [vmem:[#allocation0 + $0x41] ss:$8 sm:$0xf0] %vm35_vm0, %v267_v6  }
  0x7c   :  { %50 = vst.msk [vmem:[#allocation0 + $0x1] ss:$8 sm:$0xf] %vm35_vm0, %v266_v7   ;;  %52 = vst.msk [vmem:[#allocation0 + $0x1] ss:$8 sm:$0xf0] %vm35_vm0, %v266_v7   ;;  %v270_v10 = vpop.permute.xlu0 %269 }
  0x7d   :  { %93 = vst.msk [vmem:[#allocation0 + $0x43] ss:$8 sm:$0xf] %vm35_vm0, %v277_v8   ;;  %95 = vst.msk [vmem:[#allocation0 + $0x43] ss:$8 sm:$0xf0] %vm35_vm0, %v277_v8   ;;  %v272_v11 = vunpack.i.h.bf16 %v270_v10  ;;  %v271_v12 = vunpack.i.l.bf16 %v270_v10 }
  0x7e   :  { %84 = vst.msk [vmem:[#allocation0 + $0x3] ss:$8 sm:$0xf] %vm35_vm0, %v276_v9   ;;  %86 = vst.msk [vmem:[#allocation0 + $0x3] ss:$8 sm:$0xf0] %vm35_vm0, %v276_v9  }
  0x7f   :  { %76 = vst.msk [vmem:[#allocation0 + $0x42] ss:$8 sm:$0xf] %vm35_vm0, %v272_v11   ;;  %78 = vst.msk [vmem:[#allocation0 + $0x42] ss:$8 sm:$0xf0] %vm35_vm0, %v272_v11  }
  0x80   :  { %67 = vst.msk [vmem:[#allocation0 + $0x2] ss:$8 sm:$0xf] %vm35_vm0, %v271_v12   ;;  %69 = vst.msk [vmem:[#allocation0 + $0x2] ss:$8 sm:$0xf0] %vm35_vm0, %v271_v12  }
  0x86   :  { %v162_v28 = vld [vmem:[#allocation0 + $0x40] sm:$0xf]  ;;  %v170_v32 = vld [vmem:[#allocation0 + $0x48] sm:$0xf]  ;;  %v178_v33 = vld [vmem:[#allocation0 + $0x50] sm:$0xf] }
  0x87   :  { %v130_v13 = vld [vmem:[#allocation0 + $0x20] sm:$0xf]  ;;  %v138_v14 = vld [vmem:[#allocation0 + $0x28] sm:$0xf]  ;;  %v146_v15 = vld [vmem:[#allocation0 + $0x30] sm:$0xf]  ;;  %v163_v31 = vpack.c.bf16 %v281_v16, %v162_v28  ;;  %v171_v35 = vpack.c.bf16 %v281_v16, %v170_v32  ;;  %v179_v36 = vpack.c.bf16 %v281_v16, %v178_v33 }
  0x88   :  { %v131_v17 = vpack.c.bf16 %v281_v16, %v130_v13  ;;  %v139_v18 = vpack.c.bf16 %v281_v16, %v138_v14  ;;  %v147_v19 = vpack.c.bf16 %v281_v16, %v146_v15  ;;  %v154_v20 = vld [vmem:[#allocation0 + $0x38] sm:$0xf]  ;;  %v101_v21 = vld [vmem:[#allocation0] sm:$0xf]  ;;  %v107_v22 = vld [vmem:[#allocation0 + $0x8] sm:$0xf] }
  0x89   :  { %v155_v23 = vpack.c.bf16 %v281_v16, %v154_v20  ;;  %v102_v24 = vpack.c.bf16 %v281_v16, %v101_v21  ;;  %v108_v25 = vpack.c.bf16 %v281_v16, %v107_v22  ;;  %v114_v26 = vld [vmem:[#allocation0 + $0x10] sm:$0xf]  ;;  %v122_v27 = vld [vmem:[#allocation0 + $0x18] sm:$0xf]  ;;  %v194_v38 = vld [vmem:[#allocation0 + $0x60] sm:$0xf] }
  0x8a   :  { %243 = vst [vmem:[%s360_s1 + $0x8] sm:$0x3] %v131_v17  ;;  %244 = vst [vmem:[%s360_s1 + $0xa] sm:$0x3] %v139_v18  ;;  %v115_v29 = vpack.c.bf16 %v281_v16, %v114_v26  ;;  %v123_v30 = vpack.c.bf16 %v281_v16, %v122_v27  ;;  %v186_v34 = vld [vmem:[#allocation0 + $0x58] sm:$0xf]  ;;  %v195_v41 = vpack.c.bf16 %v281_v16, %v194_v38 }
  0x8b   :  { %245 = vst [vmem:[%s360_s1 + $0xc] sm:$0x3] %v147_v19  ;;  %246 = vst [vmem:[%s360_s1 + $0xe] sm:$0x3] %v155_v23  ;;  %v187_v37 = vpack.c.bf16 %v281_v16, %v186_v34  ;;  %v202_v39 = vld [vmem:[#allocation0 + $0x68] sm:$0xf] }
  0x8c   :  { %105 = vst [vmem:[%s360_s1] sm:$0x3] %v102_v24  ;;  %240 = vst [vmem:[%s360_s1 + $0x2] sm:$0x3] %v108_v25  ;;  %v210_v40 = vld [vmem:[#allocation0 + $0x70] sm:$0xf]  ;;  %v203_v42 = vpack.c.bf16 %v281_v16, %v202_v39 }
  0x8d   :  { %241 = vst [vmem:[%s360_s1 + $0x4] sm:$0x3] %v115_v29  ;;  %242 = vst [vmem:[%s360_s1 + $0x6] sm:$0x3] %v123_v30  ;;  %v211_v43 = vpack.c.bf16 %v281_v16, %v210_v40  ;;  %v218_v44 = vld [vmem:[#allocation0 + $0x78] sm:$0xf] }
  0x8e   :  { %247 = vst [vmem:[%s360_s1 + $0x10] sm:$0x3] %v163_v31  ;;  %248 = vst [vmem:[%s360_s1 + $0x12] sm:$0x3] %v171_v35  ;;  %v219_v45 = vpack.c.bf16 %v281_v16, %v218_v44 }
  0x8f   :  { %249 = vst [vmem:[%s360_s1 + $0x14] sm:$0x3] %v179_v36  ;;  %250 = vst [vmem:[%s360_s1 + $0x16] sm:$0x3] %v187_v37 }
  0x90   :  { %251 = vst [vmem:[%s360_s1 + $0x18] sm:$0x3] %v195_v41  ;;  %252 = vst [vmem:[%s360_s1 + $0x1a] sm:$0x3] %v203_v42 }
  0x91   :  { %253 = vst [vmem:[%s360_s1 + $0x1c] sm:$0x3] %v211_v43  ;;  %254 = vst [vmem:[%s360_s1 + $0x1e] sm:$0x3] %v219_v45 }

// kernel: decoder_forward.19
= control target key start
LH: loop header
LB: loop body
LE: loop exit
PB: predicated region body
PF: predicated region fallthrough
CT: control target
= control target key end

     0   :  { %vm19_vm0 = vcmask 785408   ;;  %v151_v0 = vmov 0.0   ;;  %vm152_vm1 = vmmov 0   ;;  %vm47_vm2 = vcmask 261120   ;;  %s195_s1 = inlined_call_operand.vmem [shape: bf16[32,96], index: 1, kind: input, shape index: {}]   ;;  %s196_s0 = inlined_call_operand.vmem [shape: bf16[16,32], index: 0, kind: input, shape index: {}]   ;;  %s197_s2 = inlined_call_operand.vmem [shape: f32[1,96], index: 2, kind: input, shape index: {}]   ;;  %s198_s3 = inlined_call_operand.vmem [shape: bf16[16,96], index: 3, kind: output, shape index: {}]  }
   0x1   :  { %138 = vmatprep.subr.bf16.mxu0 %v151_v0  ;;  %v148_v1 = vld [vmem:[%s195_s1 + $0x8] sm:$0xff]   ;;  %142 = vmatprep.mubr.msk.bf16.mxu0 %vm152_vm1, %v151_v0  ;;  %20 = vst.msk [vmem:[#allocation2] sm:$0xff] %vm19_vm0, %v151_v0  ;;  %21 = vst.msk [vmem:[#allocation2 + $0x8] sm:$0xff] %vm19_vm0, %v151_v0  ;;  %v149_v2 = vld [vmem:[%s195_s1] sm:$0xff]   ;;  %vm119_vm3 = vcmask 781312  }
   0x2   :  { %139 = vmatpush3.bf16.msra.mxu0 %v148_v1  ;;  %v150_v3 = vld [vmem:[%s196_s0] sm:$0xff]  }
   0x3   :  { %140 = vmatprep.subr.bf16.mxu0 %v151_v0  ;;  %v130_v12 = vld [vmem:[%s197_s2] ss:$0 sm:$0xff] }
   0x6   :  { %141 = vmatpush3.bf16.msra.mxu0 %v149_v2 }
   0x8   :  { %v22_v4 = vld [vmem:[#allocation2] sm:$0xff]  ;;  %v23_v8 = vld [vmem:[#allocation2 + $0x8] sm:$0xff] }
   0x9   :  { %143 = vmatmul.mubr.msk.bf16.vlgmr.msra.gmra.mxu0 %vm47_vm2, %v150_v3 }
  0xc9   :  { %v85_v5 = vpop.f32.mrf.mxu0 }
  0xca   :  { %v92_v6 = vadd.f32 %v85_v5, %v22_v4 }
  0xcb   :  { %v144_v7 = vpop.f32.mrf.mxu0 }
  0xcc   :  { %95 = vst.msk [vmem:[#allocation2] sm:$0xff] %vm19_vm0, %v92_v6 }
  0xcd   :  { %v88_v9 = vpop.f32.mrf.mxu0 }
  0xce   :  { %v93_v10 = vadd.f32 %v88_v9, %v23_v8 }
  0xcf   :  { %v145_v11 = vpop.f32.mrf.mxu0 }
  0xd0   :  { %96 = vst.msk [vmem:[#allocation2 + $0x8] sm:$0xff] %vm19_vm0, %v93_v10 }
  0xd3   :  { %v100_v13 = vld [vmem:[#allocation2] sm:$0xff] }
  0xd4   :  { %v109_v14 = vadd.f32 %v130_v12, %v100_v13 }
  0xd6   :  { %v133_v15 = vpack.c.bf16 %v109_v14, %v109_v14 }
  0xd7   :  { %v101_v16 = vld [vmem:[#allocation2 + $0x8] sm:$0xff] }
  0xd8   :  { %120 = vst.msk [vmem:[%s198_s3] sm:$0xf] %vm119_vm3, %v133_v15  ;;  %v110_v17 = vadd.f32 %v130_v12, %v101_v16 }
  0xda   :  { %v134_v18 = vpack.c.bf16 %v110_v17, %v110_v17 }
  0xdc   :  { %121 = vst.msk [vmem:[%s198_s3 + $0x4] sm:$0xf] %vm119_vm3, %v134_v18 }

// kernel: decoder_forward.22
= control target key start
LH: loop header
LB: loop body
LE: loop exit
PB: predicated region body
PF: predicated region fallthrough
CT: control target
= control target key end

     0   :  { %vm19_vm0 = vcmask 261120   ;;  %v150_v0 = vmov 0.0   ;;  %vm151_vm1 = vmmov 0   ;;  %vm118_vm2 = vcmask 257024   ;;  %s195_s1 = inlined_call_operand.vmem [shape: bf16[32,32], index: 1, kind: input, shape index: {}]   ;;  %s196_s0 = inlined_call_operand.vmem [shape: bf16[16,32], index: 0, kind: input, shape index: {}]   ;;  %s197_s2 = inlined_call_operand.vmem [shape: f32[1,32], index: 2, kind: input, shape index: {}]   ;;  %s198_s3 = inlined_call_operand.vmem [shape: bf16[16,32], index: 3, kind: output, shape index: {}]  }
   0x1   :  { %137 = vmatprep.subr.bf16.mxu0 %v150_v0  ;;  %v147_v1 = vld [vmem:[%s195_s1 + $0x8] sm:$0xff]   ;;  %141 = vmatprep.mubr.msk.bf16.mxu0 %vm151_vm1, %v150_v0  ;;  %20 = vst.msk [vmem:[#allocation2] sm:$0xff] %vm19_vm0, %v150_v0  ;;  %21 = vst.msk [vmem:[#allocation2 + $0x8] sm:$0xff] %vm19_vm0, %v150_v0  ;;  %v148_v2 = vld [vmem:[%s195_s1] sm:$0xff]  }
   0x2   :  { %138 = vmatpush3.bf16.msra.mxu0 %v147_v1  ;;  %v149_v3 = vld [vmem:[%s196_s0] sm:$0xff]  }
   0x3   :  { %139 = vmatprep.subr.bf16.mxu0 %v150_v0  ;;  %v129_v12 = vld [vmem:[%s197_s2] ss:$0 sm:$0xff] }
   0x6   :  { %140 = vmatpush3.bf16.msra.mxu0 %v148_v2 }
   0x8   :  { %v22_v4 = vld [vmem:[#allocation2] sm:$0xff]  ;;  %v23_v8 = vld [vmem:[#allocation2 + $0x8] sm:$0xff] }
   0x9   :  { %142 = vmatmul.mubr.msk.bf16.vlgmr.msra.gmra.mxu0 %vm19_vm0, %v149_v3 }
  0xc9   :  { %v85_v5 = vpop.f32.mrf.mxu0 }
  0xca   :  { %v92_v6 = vadd.f32 %v85_v5, %v22_v4 }
  0xcb   :  { %v143_v7 = vpop.f32.mrf.mxu0 }
  0xcc   :  { %94 = vst.msk [vmem:[#allocation2] sm:$0xff] %vm19_vm0, %v92_v6 }
  0xcd   :  { %v88_v9 = vpop.f32.mrf.mxu0 }
  0xce   :  { %v93_v10 = vadd.f32 %v88_v9, %v23_v8 }
  0xcf   :  { %v144_v11 = vpop.f32.mrf.mxu0 }
  0xd0   :  { %95 = vst.msk [vmem:[#allocation2 + $0x8] sm:$0xff] %vm19_vm0, %v93_v10 }
  0xd3   :  { %v99_v13 = vld [vmem:[#allocation2] sm:$0xff] }
  0xd4   :  { %v108_v14 = vadd.f32 %v129_v12, %v99_v13 }
  0xd6   :  { %v132_v15 = vpack.c.bf16 %v108_v14, %v108_v14 }
  0xd7   :  { %v100_v16 = vld [vmem:[#allocation2 + $0x8] sm:$0xff] }
  0xd8   :  { %119 = vst.msk [vmem:[%s198_s3] sm:$0xf] %vm118_vm2, %v132_v15  ;;  %v109_v17 = vadd.f32 %v129_v12, %v100_v16 }
  0xda   :  { %v133_v18 = vpack.c.bf16 %v109_v17, %v109_v17 }
  0xdc   :  { %120 = vst.msk [vmem:[%s198_s3 + $0x4] sm:$0xf] %vm118_vm2, %v133_v18 }

// kernel: decoder_forward.21
= control target key start
LH: loop header
LB: loop body
LE: loop exit
PB: predicated region body
PF: predicated region fallthrough
CT: control target
= control target key end

     0   :  { %vm28_vm0 = vcmask 261120   ;;  %v220_v0 = vmov 0.0   ;;  %vm221_vm1 = vmmov 0   ;;  %vm178_vm2 = vcmask 257024   ;;  %s293_s1 = inlined_call_operand.vmem [shape: bf16[32,32], index: 1, kind: input, shape index: {}]   ;;  %s294_s0 = inlined_call_operand.vmem [shape: bf16[16,32], index: 0, kind: input, shape index: {}]   ;;  %s295_s3 = inlined_call_operand.vmem [shape: bf16[16,32], index: 3, kind: input, shape index: {}]   ;;  %s296_s2 = inlined_call_operand.vmem [shape: f32[1,32], index: 2, kind: input, shape index: {}]   ;;  %s297_s4 = inlined_call_operand.vmem [shape: f32[1,32], index: 4, kind: input, shape index: {}]   ;;  %s298_s5 = inlined_call_operand.vmem [shape: f32[1,32], index: 5, kind: input, shape index: {}]   ;;  %s299_s6 = inlined_call_operand.vmem [shape: bf16[16,32], index: 6, kind: output, shape index: {}]  }
   0x1   :  { %203 = vmatprep.subr.bf16.mxu0 %v220_v0  ;;  %v213_v1 = vld [vmem:[%s293_s1 + $0x8] sm:$0xff]   ;;  %207 = vmatprep.mubr.msk.bf16.mxu0 %vm221_vm1, %v220_v0  ;;  %29 = vst.msk [vmem:[#allocation2] sm:$0xff] %vm28_vm0, %v220_v0  ;;  %30 = vst.msk [vmem:[#allocation2 + $0x8] sm:$0xff] %vm28_vm0, %v220_v0  ;;  %v214_v2 = vld [vmem:[%s293_s1] sm:$0xff]  }
   0x2   :  { %204 = vmatpush3.bf16.msra.mxu0 %v213_v1  ;;  %v215_v3 = vld [vmem:[%s294_s0] sm:$0xff]  }
   0x3   :  { %205 = vmatprep.subr.bf16.mxu0 %v220_v0  ;;  %v197_v12 = vld [vmem:[%s295_s3] sm:$0xff]  }
   0x4   :  { %v189_v13 = vld [vmem:[%s296_s2] ss:$0 sm:$0xff]  ;;  %v198_v14 = vunpack.c.l.bf16 %v197_v12  ;;  %v199_v18 = vunpack.c.h.bf16 %v197_v12 }
   0x5   :  { %v190_v41 = vld [vmem:[%s297_s4] ss:$0 sm:$0xff] }
   0x6   :  { %206 = vmatpush3.bf16.msra.mxu0 %v214_v2  ;;  %v191_v43 = vld [vmem:[%s298_s5] ss:$0 sm:$0xff] }
   0x8   :  { %v31_v4 = vld [vmem:[#allocation2] sm:$0xff]  ;;  %v32_v8 = vld [vmem:[#allocation2 + $0x8] sm:$0xff] }
   0x9   :  { %208 = vmatmul.mubr.msk.bf16.vlgmr.msra.gmra.mxu0 %vm28_vm0, %v215_v3 }
  0xc9   :  { %v94_v5 = vpop.f32.mrf.mxu0 }
  0xca   :  { %v101_v6 = vadd.f32 %v94_v5, %v31_v4 }
  0xcb   :  { %v209_v7 = vpop.f32.mrf.mxu0 }
  0xcc   :  { %103 = vst.msk [vmem:[#allocation2] sm:$0xff] %vm28_vm0, %v101_v6 }
  0xcd   :  { %v97_v9 = vpop.f32.mrf.mxu0 }
  0xce   :  { %v102_v10 = vadd.f32 %v97_v9, %v32_v8 }
  0xcf   :  { %v210_v11 = vpop.f32.mrf.mxu0 }
  0xd0   :  { %104 = vst.msk [vmem:[#allocation2 + $0x8] sm:$0xff] %vm28_vm0, %v102_v10 }
  0xd3   :  { %v108_v15 = vld [vmem:[#allocation2] sm:$0xff] }
  0xd4   :  { %v117_v16 = vadd.f32 %v189_v13, %v108_v15 }
  0xd6   :  { %v123_v17 = vadd.f32 %v198_v14, %v117_v16 }
  0xd7   :  { %v109_v19 = vld [vmem:[#allocation2 + $0x8] sm:$0xff] }
  0xd8   :  { %v125_v20 = vsel %vm28_vm0, %v123_v17, 0.0  ;;  %v118_v21 = vadd.f32 %v189_v13, %v109_v19 }
  0xd9   :  { %126 = vadd.xlane.f32.xlu0 %v125_v20 }
  0xda   :  { %v124_v22 = vadd.f32 %v199_v18, %v118_v21 }
  0xdc   :  { %v128_v23 = vsel %vm28_vm0, %v124_v22, 0.0 }
  0xdd   :  { %129 = vadd.xlane.f32.xlu0 %v128_v23 }
 0x162   :  { %v127_v24 = vpop.xlane.xlu0 %126 }
 0x163   :  { %v132_v25 = vmul.f32 0.03125, %v127_v24 }
 0x165   :  { %v134_v26 = vsub.f32 %v123_v17, %v132_v25 }
 0x166   :  { %v130_v27 = vpop.xlane.xlu0 %129 }
 0x167   :  { %v133_v28 = vmul.f32 0.03125, %v130_v27  ;;  %v136_v29 = vmul.f32 %v134_v26, %v134_v26 }
 0x169   :  { %v135_v30 = vsub.f32 %v124_v22, %v133_v28  ;;  %v138_v31 = vsel %vm28_vm0, %v136_v29, 0.0 }
 0x16a   :  { %139 = vadd.xlane.f32.xlu1 %v138_v31 }
 0x16b   :  { %v137_v32 = vmul.f32 %v135_v30, %v135_v30 }
 0x16d   :  { %v141_v33 = vsel %vm28_vm0, %v137_v32, 0.0 }
 0x16e   :  { %142 = vadd.xlane.f32.xlu1 %v141_v33 }
 0x1f3   :  { %v140_v34 = vpop.xlane.xlu1 %139 }
 0x1f4   :  { %v144_v35 = vmul.f32 0.03125, %v140_v34 }
 0x1f6   :  { %v146_v36 = vadd.f32 1e-05, %v144_v35 }
 0x1f7   :  { %v143_v37 = vpop.xlane.xlu1 %142 }
 0x1f8   :  { %216 = vrsqrt.f32 %v146_v36  ;;  %v145_v38 = vmul.f32 0.03125, %v143_v37 }
 0x1fa   :  { %v147_v39 = vadd.f32 1e-05, %v145_v38 }
 0x1fc   :  { %218 = vrsqrt.f32 %v147_v39 }
 0x205   :  { %v217_v40 = vpop.eup %216 }
 0x206   :  { %v150_v42 = vmul.f32 %v217_v40, %v134_v26 }
 0x208   :  { %v159_v44 = vmul.f32 %v190_v41, %v150_v42 }
 0x209   :  { %v219_v45 = vpop.eup %218 }
 0x20a   :  { %v168_v46 = vadd.f32 %v191_v43, %v159_v44  ;;  %v151_v47 = vmul.f32 %v219_v45, %v135_v30 }
 0x20c   :  { %v194_v48 = vpack.c.bf16 %v168_v46, %v168_v46  ;;  %v160_v49 = vmul.f32 %v190_v41, %v151_v47 }
 0x20e   :  { %179 = vst.msk [vmem:[%s299_s6] sm:$0xf] %vm178_vm2, %v194_v48  ;;  %v169_v50 = vadd.f32 %v191_v43, %v160_v49 }
 0x210   :  { %v195_v51 = vpack.c.bf16 %v169_v50, %v169_v50 }
 0x212   :  { %180 = vst.msk [vmem:[%s299_s6 + $0x4] sm:$0xf] %vm178_vm2, %v195_v51 }

// kernel: decoder_forward.20
= control target key start
LH: loop header
LB: loop body
LE: loop exit
PB: predicated region body
PF: predicated region fallthrough
CT: control target
= control target key end

     0   :  { %s1285_s15 = smov 0   ;;  %s1287_s16 = smov 0   ;;  %s1471_s0 = inlined_call_operand.vmem [shape: bf16[2,4,8,8], index: 0, kind: input, shape index: {}]   ;;  %s1472_s1 = inlined_call_operand.vmem [shape: bf16[2,4,8,8], index: 1, kind: input, shape index: {}]   ;;  %s1473_s2 = inlined_call_operand.vmem [shape: bf16[2,4,8,8], index: 2, kind: input, shape index: {}]   ;;  %s1474_s3 = inlined_call_operand.vmem [shape: bf16[2,8,8], index: 3, kind: input, shape index: {}]   ;;  %s1475_s4 = inlined_call_operand.vmem [shape: bf16[2,4,8,8], index: 4, kind: output, shape index: {}]  }
   0x1   :  { %s1289_s17 = smov 0  }
   0x2 LB: > { %s33_s18 = sadd.s32 1, %s1250_s16  ;;  %p1081_p0 = scmp.ge.s32.totalorder %s1254_s17, 1  ;;  %s1254_s17 = sphi %s1289_s17, %s14_s17   ;;  %s1250_s16 = sphi %s1287_s16, %s1477_s16   ;;  %s1246_s15 = sphi %s1285_s15, %s1476_s15  }
   0x3   : > { %p35_p1 = scmp.ge.s32.totalorder %s33_s18, 2  ;;  %p237_p2 = scmp.lt.s32.totalorder %s1254_s17, 3 }
   0x5   : > { %s1479_s18 = smov (%p35_p1, %s33_s18), 0  ;;  %p238_p3 = pnand %p1081_p0, %p237_p2 }
   0x6   : > { %p295_p4 = scmp.lt.s32.totalorder (!%p238_p3), %s1246_s15, 1 }
   0x7   : > { %241 = sbr.rel (%p238_p3) target bundleno = 806 (0x326), region = 36 }
   0xc   : > { %vm351_vm0 = vcmask 64512   ;;  %v1256_v0 = vmov 0.0   ;;  %s1481_s15 = smov (!%p295_p4, %s1246_s15), 1  ;;  %vm1257_vm1 = vmmov 0   ;;  %vm342_vm2 = vcmask 7168  }
   0xd   : > { %1130 = vmatprep.subr.bf16.mxu0 %v1256_v0  ;;  %1136 = vmatprep.subr.bf16.mxu1 %v1256_v0  ;;  %352 = vst.msk [vmem:[#allocation4] sm:$0xff] %vm351_vm0, %v1256_v0  ;;  %353 = vst.msk [vmem:[#allocation4 + $0x8] sm:$0xff] %vm351_vm0, %v1256_v0  ;;  %s1320_s19 = sshll.u32 %s1481_s15, 4  ;;  %v1258_v23 = vmov -inf   ;;  %s1088_s26 = sshll.u32 %s1481_s15, 2  ;;  %v1259_v50 = vmov 0  }
   0xe   : > { %354 = vst.msk [vmem:[#allocation4 + $0x10] sm:$0xff] %vm351_vm0, %v1256_v0  ;;  %355 = vst.msk [vmem:[#allocation4 + $0x18] sm:$0xff] %vm351_vm0, %v1256_v0  ;;  %1132 = vmatprep.mubr.msk.bf16.mxu0 %vm1257_vm1, %v1256_v0  ;;  %1138 = vmatprep.mubr.msk.bf16.mxu1 %vm1257_vm1, %v1256_v0  ;;  %s310_s22 = scalar_lea.vmem %s1472_s1, %s1320_s19  ;;  %s302_s25 = scalar_lea.vmem %s1471_s0, %s1320_s19  ;;  %vm695_vm3 = vcmask 1043456   ;;  %vm932_vm4 = vcmask 60416  }
   0xf   : > { %v372_v1 = vld [vmem:[%s310_s22] sm:$0xf]  ;;  %v373_v2 = vld [vmem:[%s310_s22 + $0x4] sm:$0xf]  ;;  %v1113_v8 = vld [vmem:[%s302_s25 + $0x8] sm:$0xff]   ;;  %343 = vst.msk [vmem:[#allocation2] sm:$0xff] %vm342_vm2, %v1258_v23  ;;  %s328_s29 = scalar_lea.vmem %s1474_s3, %s1088_s26  ;;  %1206 = vset.pattern.permute.xlu0 %v1259_v50  ;;  %1207 = vset.pattern.permute.xlu1 %v1259_v50  ;;  %s318_s6 = scalar_lea.vmem %s1473_s2, %s1320_s19 }
  0x10   : > { %v1106_v3 = vld [vmem:[%s302_s25] sm:$0xff]   ;;  %v383_v4 = vsel %vm351_vm0, %v372_v1, 0  ;;  %v429_v5 = vsel %vm351_vm0, %v373_v2, 0  ;;  %v374_v11 = vld [vmem:[%s310_s22 + $0x8] sm:$0xf]  ;;  %v1111_v13 = vunpack.c.l.bf16 %v1113_v8  ;;  %v1112_v14 = vunpack.c.h.bf16 %v1113_v8  ;;  %344 = vst.msk [vmem:[#allocation2 + $0x8] sm:$0xff] %vm342_vm2, %v1258_v23  ;;  %s336_s9 = scalar_lea.vmem %s1475_s4, %s1320_s19 }
  0x11   : > { %v1107_v6 = vunpack.c.l.bf16 %v1106_v3  ;;  %v1108_v7 = vunpack.c.h.bf16 %v1106_v3  ;;  %1131 = vmatpush3.bf16.xpose.msra.mxu0 %v383_v4  ;;  %1137 = vmatpush3.bf16.xpose.msra.mxu1 %v429_v5  ;;  %v375_v12 = vld [vmem:[%s310_s22 + $0xc] sm:$0xf]  ;;  %v475_v17 = vsel %vm351_vm0, %v374_v11, 0  ;;  %345 = vst.msk [vmem:[#allocation2 + $0x10] sm:$0xff] %vm342_vm2, %v1258_v23  ;;  %346 = vst.msk [vmem:[#allocation2 + $0x18] sm:$0xff] %vm342_vm2, %v1258_v23 }
  0x12   : > { %1142 = vmatprep.subr.bf16.mxu0 %v1256_v0  ;;  %1148 = vmatprep.subr.bf16.mxu1 %v1256_v0  ;;  %v521_v18 = vsel %vm351_vm0, %v375_v12, 0  ;;  %v366_v19 = vmul.f32 0.35355338, %v1111_v13  ;;  %v367_v20 = vmul.f32 0.35355338, %v1112_v14  ;;  %347 = vst.msk [vmem:[#allocation3] sm:$0xff] %vm342_vm2, %v1256_v0 }
  0x13   : > { %v364_v9 = vmul.f32 0.35355338, %v1107_v6  ;;  %v365_v10 = vmul.f32 0.35355338, %v1108_v7  ;;  %348 = vst.msk [vmem:[#allocation3 + $0x8] sm:$0xff] %vm342_vm2, %v1256_v0  ;;  %349 = vst.msk [vmem:[#allocation3 + $0x10] sm:$0xff] %vm342_vm2, %v1256_v0 }
  0x14   : > { %v370_v21 = vpack.c.bf16 %v366_v19, %v366_v19  ;;  %v371_v22 = vpack.c.bf16 %v367_v20, %v367_v20  ;;  %350 = vst.msk [vmem:[#allocation3 + $0x18] sm:$0xff] %vm342_vm2, %v1256_v0  ;;  %v376_v24 = vld [vmem:[%s328_s29] sm:$0xf]  ;;  %v689_v6 = vld [vmem:[%s318_s6 + $0x4] sm:$0xf] }
  0x15   : > { %v368_v15 = vpack.c.bf16 %v364_v9, %v364_v9  ;;  %v369_v16 = vpack.c.bf16 %v365_v10, %v365_v10  ;;  %v377_v25 = vunpack.c.l.bf16 %v376_v24  ;;  %v688_v3 = vld [vmem:[%s318_s6] sm:$0xf]  ;;  %v743_v7 = vsel %vm695_vm3, %v689_v6, 0  ;;  %v690_v8 = vld [vmem:[%s318_s6 + $0x8] sm:$0xf] }
  0x16   : > { %v1379_v51 = vld [vmem:[#allocation2] sm:$0xff]  ;;  %v697_v5 = vsel %vm695_vm3, %v688_v3, 0  ;;  %v789_v9 = vsel %vm695_vm3, %v690_v8, 0  ;;  %v691_v10 = vld [vmem:[%s318_s6 + $0xc] sm:$0xf] }
  0x17   : > { %v1384_v54 = vld [vmem:[#allocation2 + $0x8] sm:$0xff]  ;;  %v835_v11 = vsel %vm695_vm3, %v691_v10, 0 }
  0x18   : > { %1133 = vmatmul.mubr.msk.bf16.vlgmr.msra.gmra.mxu0 %vm351_vm0, %v368_v15  ;;  %1139 = vmatmul.mubr.msk.bf16.vlgmr.msra.gmra.mxu1 %vm351_vm0, %v369_v16  ;;  %v1394_v58 = vld [vmem:[#allocation2 + $0x10] sm:$0xff]  ;;  %v1404_v62 = vld [vmem:[#allocation2 + $0x18] sm:$0xff] }
  0x19   : > { %1143 = vmatpush3.bf16.xpose.msra.mxu0 %v475_v17  ;;  %1149 = vmatpush3.bf16.xpose.msra.mxu1 %v521_v18 }
  0x1a   : > { %1144 = vmatprep.mubr.msk.bf16.mxu0 %vm1257_vm1, %v1256_v0  ;;  %1150 = vmatprep.mubr.msk.bf16.mxu1 %vm1257_vm1, %v1256_v0  ;;  %v629_v50 = vld [vmem:[#allocation3 + $0x10] sm:$0xff] }
  0x1b   : > { %1154 = vmatprep.subr.bf16.mxu0 %v1256_v0  ;;  %1160 = vmatprep.subr.bf16.mxu1 %v1256_v0 }
  0x20   : > { %1145 = vmatmul.mubr.msk.bf16.vlgmr.msra.gmra.mxu0 %vm351_vm0, %v370_v21  ;;  %1151 = vmatmul.mubr.msk.bf16.vlgmr.msra.gmra.mxu1 %vm351_vm0, %v371_v22 }
  0x21   : > { %1156 = vmatprep.mubr.msk.bf16.mxu0 %vm1257_vm1, %v1256_v0  ;;  %1162 = vmatprep.mubr.msk.bf16.mxu1 %vm1257_vm1, %v1256_v0 }
  0x22   : > { %1155 = vmatpush3.bf16.msra.mxu0 %v697_v5  ;;  %1161 = vmatpush3.bf16.msra.mxu1 %v743_v7  ;;  %v656_v5 = vld [vmem:[#allocation4] sm:$0xff]  ;;  %v657_v7 = vld [vmem:[#allocation4 + $0x8] sm:$0xff] }
  0x23   : > { %1166 = vmatprep.subr.bf16.mxu0 %v1256_v0  ;;  %1172 = vmatprep.subr.bf16.mxu1 %v1256_v0 }
  0xd8   : > { %v419_v26 = vpop.f32.mrf.mxu0  ;;  %v465_v27 = vpop.f32.mrf.mxu1 }
  0xd9   : > { %v1366_v28 = vadd.f32 %v419_v26, %v377_v25  ;;  %v1368_v29 = vadd.f32 %v465_v27, %v377_v25 }
  0xda   : > { %v1134_v30 = vpop.f32.mrf.mxu0  ;;  %v1140_v31 = vpop.f32.mrf.mxu1 }
  0xdb   : > { %v567_v32 = vsel %vm351_vm0, %v1366_v28, -inf  ;;  %v570_v35 = vsel %vm351_vm0, %v1368_v29, -inf }
  0xdc   : > { %v468_v33 = vpop.f32.mrf.mxu1  ;;  %568 = vmax.xlane.f32.xlu0 %v567_v32  ;;  %v422_v34 = vpop.f32.mrf.mxu0 }
  0xde   : > { %v1135_v36 = vpop.f32.mrf.mxu0  ;;  %v1141_v37 = vpop.f32.mrf.mxu1 }
  0xe0   : > { %v557_v38 = vpop.f32.mrf.mxu1  ;;  %571 = vmax.xlane.f32.xlu0 %v570_v35  ;;  %v511_v39 = vpop.f32.mrf.mxu0 }
  0xe1   : > { %v1374_v40 = vadd.f32 %v557_v38, %v377_v25  ;;  %v512_v41 = vadd.f32 %v511_v39, %v377_v25 }
  0xe2   : > { %v1146_v42 = vpop.f32.mrf.mxu0  ;;  %v1152_v43 = vpop.f32.mrf.mxu1 }
  0xe3   : > { %v573_v44 = vsel %vm351_vm0, %v512_v41, -inf  ;;  %v576_v47 = vsel %vm351_vm0, %v1374_v40, -inf  ;;  %v627_v43 = vld [vmem:[#allocation3] sm:$0xff] }
  0xe4   : > { %v560_v45 = vpop.f32.mrf.mxu1  ;;  %574 = vmax.xlane.f32.xlu1 %v573_v44  ;;  %v514_v46 = vpop.f32.mrf.mxu0 }
  0xe5   : > { %v628_v46 = vld [vmem:[#allocation3 + $0x8] sm:$0xff] }
  0xe6   : > { %v1147_v48 = vpop.f32.mrf.mxu0  ;;  %v1153_v49 = vpop.f32.mrf.mxu1 }
  0xe8   : > { %577 = vmax.xlane.f32.xlu1 %v576_v47 }
 0x165   : > { %v569_v52 = vpop.xlane.xlu0 %568 }
 0x166   : > { %v1382_v53 = vmax.f32 %v1379_v51, %v569_v52 }
 0x168   : > { %v583_v55 = vsub.f32 %v1379_v51, %v1382_v53  ;;  %885 = vst.msk [vmem:[#allocation2] sm:$0xff] %vm342_vm2, %v1382_v53  ;;  %597 = vperm.xlu0 %1206, %v1382_v53  }
 0x169   : > { %v572_v56 = vpop.xlane.xlu0 %571 }
 0x16a   : > { %v1392_v57 = vmax.f32 %v1384_v54, %v572_v56  ;;  %v587_v35 = vmul.f32 1.442695, %v583_v55 }
 0x16c   : > { %v584_v59 = vsub.f32 %v1384_v54, %v1392_v57  ;;  %886 = vst.msk [vmem:[#allocation2 + $0x8] sm:$0xff] %vm342_vm2, %v1392_v57  ;;  %602 = vperm.xlu1 %1207, %v1392_v57   ;;  %v630_v54 = vld [vmem:[#allocation3 + $0x18] sm:$0xff] }
 0x16d   : > { %v575_v60 = vpop.xlane.xlu1 %574 }
 0x16e   : > { %v1402_v61 = vmax.f32 %v1394_v58, %v575_v60  ;;  %v589_v33 = vmul.f32 1.442695, %v584_v59 }
 0x170   : > { %v585_v63 = vsub.f32 %v1394_v58, %v1402_v61  ;;  %887 = vst.msk [vmem:[#allocation2 + $0x10] sm:$0xff] %vm342_vm2, %v1402_v61  ;;  %607 = vperm.xlu1 %1207, %v1402_v61  }
 0x171   : > { %v578_v1 = vpop.xlane.xlu1 %577 }
 0x172   : > { %v1412_v2 = vmax.f32 %v1404_v62, %v578_v1 }
 0x174   : > { %v586_v4 = vsub.f32 %v1404_v62, %v1412_v2  ;;  %888 = vst.msk [vmem:[#allocation2 + $0x18] sm:$0xff] %vm342_vm2, %v1412_v2  ;;  %612 = vperm.xlu1 %1207, %v1412_v2  }
 0x176   : > { %v593_v38 = vmul.f32 1.442695, %v586_v4 }
 0x1e3   : > { %v598_v12 = vpop.permute.xlu0 %597 }
 0x1e4   : > { %v615_v13 = vsub.f32 %v1366_v28, %v598_v12 }
 0x1e6   : > { %v619_v14 = vmul.f32 1.442695, %v615_v13 }
 0x1e7   : > { %v603_v15 = vpop.permute.xlu1 %602 }
 0x1e8   : > { %1208 = vpow2.f32 %v619_v14  ;;  %v616_v16 = vsub.f32 %v1368_v29, %v603_v15  ;;  %v658_v14 = vld [vmem:[#allocation4 + $0x10] sm:$0xff] }
 0x1ea   : > { %v621_v17 = vmul.f32 1.442695, %v616_v16 }
 0x1eb   : > { %v608_v18 = vpop.permute.xlu1 %607 }
 0x1ec   : > { %1210 = vpow2.f32 %v621_v17  ;;  %v617_v19 = vsub.f32 %v512_v41, %v608_v18 }
 0x1ee   : > { %v623_v20 = vmul.f32 1.442695, %v617_v19 }
 0x1ef   : > { %v613_v21 = vpop.permute.xlu1 %612 }
 0x1f0   : > { %1212 = vpow2.f32 %v623_v20  ;;  %v618_v22 = vsub.f32 %v1374_v40, %v613_v21 }
 0x1f2   : > { %v625_v23 = vmul.f32 1.442695, %v618_v22  ;;  %v659_v22 = vld [vmem:[#allocation4 + $0x18] sm:$0xff] }
 0x1f4   : > { %1214 = vpow2.f32 %v625_v23 }
 0x1f5   : > { %v1209_v24 = vpop.eup %1208  ;;  %1216 = vpow2.f32 %v589_v33 }
 0x1f6   : > { %v635_v25 = vsel %vm351_vm0, %v1209_v24, 0.0  ;;  %v684_v26 = vpack.c.bf16 %v1209_v24, %v1209_v24  ;;  %1218 = vpow2.f32 %v587_v35 }
 0x1f7   : > { %636 = vadd.xlane.f32.xlu1 %v635_v25 }
 0x1f8   : > { %1157 = vmatmul.mubr.msk.bf16.vlgmr.msra.gmra.mxu0 %vm351_vm0, %v684_v26 }
 0x1f9   : > { %v1211_v27 = vpop.eup %1210  ;;  %1167 = vmatpush3.bf16.msra.mxu0 %v789_v9  ;;  %1168 = vmatprep.mubr.msk.bf16.mxu0 %vm1257_vm1, %v1256_v0 }
 0x1fa   : > { %v638_v28 = vsel %vm351_vm0, %v1211_v27, 0.0  ;;  %v685_v29 = vpack.c.bf16 %v1211_v27, %v1211_v27 }
 0x1fb   : > { %639 = vadd.xlane.f32.xlu0 %v638_v28 }
 0x1fc   : > { %1163 = vmatmul.mubr.msk.bf16.vlgmr.msra.gmra.mxu1 %vm351_vm0, %v685_v29 }
 0x1fd   : > { %v1213_v30 = vpop.eup %1212  ;;  %1173 = vmatpush3.bf16.msra.mxu1 %v835_v11  ;;  %1174 = vmatprep.mubr.msk.bf16.mxu1 %vm1257_vm1, %v1256_v0  ;;  %v591_v0 = vmul.f32 1.442695, %v585_v63 }
 0x1fe   : > { %v641_v31 = vsel %vm351_vm0, %v1213_v30, 0.0  ;;  %v686_v32 = vpack.c.bf16 %v1213_v30, %v1213_v30 }
 0x1ff   : > { %642 = vadd.xlane.f32.xlu1 %v641_v31  ;;  %1220 = vpow2.f32 %v591_v0 }
 0x200   : > { %1169 = vmatmul.mubr.msk.bf16.vlgmr.msra.gmra.mxu0 %vm351_vm0, %v686_v32  ;;  %1222 = vpow2.f32 %v593_v38 }
 0x201   : > { %v1215_v34 = vpop.eup %1214 }
 0x202   : > { %v644_v36 = vsel %vm351_vm0, %v1215_v34, 0.0  ;;  %v687_v37 = vpack.c.bf16 %v1215_v34, %v1215_v34  ;;  %v1217_v39 = vpop.eup %1216 }
 0x203   : > { %645 = vadd.xlane.f32.xlu1 %v644_v36  ;;  %v1219_v40 = vpop.eup %1218  ;;  %v632_v48 = vmul.f32 %v1217_v39, %v628_v46 }
 0x204   : > { %1175 = vmatmul.mubr.msk.bf16.vlgmr.msra.gmra.mxu1 %vm351_vm0, %v687_v37  ;;  %v631_v44 = vmul.f32 %v1219_v40, %v627_v43 }
 0x20c   : > { %v1221_v41 = vpop.eup %1220 }
 0x20d   : > { %v1223_v42 = vpop.eup %1222  ;;  %v633_v52 = vmul.f32 %v1221_v41, %v629_v50 }
 0x20e   : > { %v634_v57 = vmul.f32 %v1223_v42, %v630_v54 }
 0x211   : > { %667 = vperm.xlu0 %1206, %v1217_v39  }
 0x214   : > { %662 = vperm.xlu1 %1207, %v1219_v40  }
 0x218   : > { %672 = vperm.xlu1 %1207, %v1221_v41  }
 0x21c   : > { %677 = vperm.xlu1 %1207, %v1223_v42  }
 0x280   : > { %v637_v45 = vpop.xlane.xlu1 %636 }
 0x281   : > { %v647_v47 = vadd.f32 %v637_v45, %v631_v44 }
 0x283   : > { %652 = vst.msk [vmem:[#allocation3] sm:$0xff] %vm342_vm2, %v647_v47 }
 0x284   : > { %v640_v49 = vpop.xlane.xlu0 %639 }
 0x285   : > { %v648_v51 = vadd.f32 %v640_v49, %v632_v48 }
 0x287   : > { %653 = vst.msk [vmem:[#allocation3 + $0x8] sm:$0xff] %vm342_vm2, %v648_v51 }
 0x288   : > { %v643_v53 = vpop.xlane.xlu1 %642 }
 0x289   : > { %v649_v55 = vadd.f32 %v643_v53, %v633_v52 }
 0x28a   : > { %v896_v56 = vld [vmem:[#allocation3] sm:$0xff] }
 0x28b   : > { %654 = vst.msk [vmem:[#allocation3 + $0x10] sm:$0xff] %vm342_vm2, %v649_v55  ;;  %1224 = vrcp.f32 %v896_v56 }
 0x28c   : > { %v646_v58 = vpop.xlane.xlu1 %645  ;;  %v668_v8 = vpop.permute.xlu0 %667 }
 0x28d   : > { %v650_v59 = vadd.f32 %v646_v58, %v634_v57  ;;  %v681_v13 = vmul.f32 %v668_v8, %v657_v7 }
 0x28e   : > { %v897_v60 = vld [vmem:[#allocation3 + $0x8] sm:$0xff] }
 0x28f   : > { %655 = vst.msk [vmem:[#allocation3 + $0x18] sm:$0xff] %vm342_vm2, %v650_v59  ;;  %1226 = vrcp.f32 %v897_v60 }
 0x290   : > { %v663_v4 = vpop.permute.xlu1 %662 }
 0x291   : > { %v680_v6 = vmul.f32 %v663_v4, %v656_v5 }
 0x292   : > { %v898_v61 = vld [vmem:[#allocation3 + $0x10] sm:$0xff] }
 0x293   : > { %1228 = vrcp.f32 %v898_v61 }
 0x294   : > { %v673_v10 = vpop.permute.xlu1 %672 }
 0x295   : > { %v682_v20 = vmul.f32 %v673_v10, %v658_v14 }
 0x296   : > { %v899_v62 = vld [vmem:[#allocation3 + $0x18] sm:$0xff] }
 0x297   : > { %1230 = vrcp.f32 %v899_v62 }
 0x298   : > { %v1225_v63 = vpop.eup %1224  ;;  %v678_v21 = vpop.permute.xlu1 %677 }
 0x299   : > { %906 = vperm.xlu1 %1207, %v1225_v63   ;;  %v683_v28 = vmul.f32 %v678_v21, %v659_v22 }
 0x29c   : > { %v1227_v1 = vpop.eup %1226 }
 0x29d   : > { %911 = vperm.xlu0 %1206, %v1227_v1  }
 0x2a0   : > { %v1229_v2 = vpop.eup %1228 }
 0x2a1   : > { %916 = vperm.xlu1 %1207, %v1229_v2  }
 0x2a4   : > { %v1231_v3 = vpop.eup %1230 }
 0x2a5   : > { %921 = vperm.xlu0 %1206, %v1231_v3  }
 0x2b8   : > { %v733_v9 = vpop.f32.mrf.mxu0 }
 0x2b9   : > { %v877_v11 = vadd.f32 %v733_v9, %v680_v6 }
 0x2ba   : > { %v1158_v12 = vpop.f32.mrf.mxu0 }
 0x2bb   : > { %881 = vst.msk [vmem:[#allocation4] sm:$0xff] %vm351_vm0, %v877_v11 }
 0x2bc   : > { %v736_v15 = vpop.f32.mrf.mxu0  ;;  %v779_v16 = vpop.f32.mrf.mxu1 }
 0x2bd   : > { %v878_v17 = vadd.f32 %v779_v16, %v681_v13 }
 0x2be   : > { %v1159_v18 = vpop.f32.mrf.mxu0  ;;  %v1164_v19 = vpop.f32.mrf.mxu1 }
 0x2bf   : > { %882 = vst.msk [vmem:[#allocation4 + $0x8] sm:$0xff] %vm351_vm0, %v878_v17 }
 0x2c0   : > { %v782_v23 = vpop.f32.mrf.mxu1  ;;  %v825_v24 = vpop.f32.mrf.mxu0 }
 0x2c1   : > { %v879_v25 = vadd.f32 %v825_v24, %v682_v20 }
 0x2c2   : > { %v1165_v26 = vpop.f32.mrf.mxu1  ;;  %v1170_v27 = vpop.f32.mrf.mxu0  ;;  %v892_v37 = vld [vmem:[#allocation4] sm:$0xff] }
 0x2c3   : > { %883 = vst.msk [vmem:[#allocation4 + $0x10] sm:$0xff] %vm351_vm0, %v879_v25 }
 0x2c4   : > { %v828_v29 = vpop.f32.mrf.mxu0  ;;  %v871_v30 = vpop.f32.mrf.mxu1 }
 0x2c5   : > { %v880_v31 = vadd.f32 %v871_v30, %v683_v28 }
 0x2c6   : > { %v1171_v32 = vpop.f32.mrf.mxu0  ;;  %v1176_v33 = vpop.f32.mrf.mxu1  ;;  %v893_v39 = vld [vmem:[#allocation4 + $0x8] sm:$0xff] }
 0x2c7   : > { %884 = vst.msk [vmem:[#allocation4 + $0x18] sm:$0xff] %vm351_vm0, %v880_v31 }
 0x2c8   : > { %v874_v34 = vpop.f32.mrf.mxu1 }
 0x2ca   : > { %v1177_v35 = vpop.f32.mrf.mxu1  ;;  %v894_v44 = vld [vmem:[#allocation4 + $0x10] sm:$0xff] }
 0x2ce   : > { %v895_v48 = vld [vmem:[#allocation4 + $0x18] sm:$0xff] }
 0x314   : > { %v907_v36 = vpop.permute.xlu1 %906 }
 0x315   : > { %v924_v0 = vmul.f32 %v907_v36, %v892_v37 }
 0x317   : > { %v928_v38 = vpack.c.bf16 %v924_v0, %v924_v0 }
 0x318   : > { %v912_v40 = vpop.permute.xlu0 %911 }
 0x319   : > { %933 = vst.msk [vmem:[%s336_s9] sm:$0xf] %vm932_vm4, %v928_v38  ;;  %v925_v41 = vmul.f32 %v912_v40, %v893_v39 }
 0x31b   : > { %v929_v42 = vpack.c.bf16 %v925_v41, %v925_v41 }
 0x31c   : > { %v917_v43 = vpop.permute.xlu1 %916 }
 0x31d   : > { %934 = vst.msk [vmem:[%s336_s9 + $0x4] sm:$0xf] %vm932_vm4, %v929_v42  ;;  %v926_v45 = vmul.f32 %v917_v43, %v894_v44 }
 0x31f   : > { %v930_v46 = vpack.c.bf16 %v926_v45, %v926_v45 }
 0x320   : > { %v922_v47 = vpop.permute.xlu0 %921 }
 0x321   : > { %935 = vst.msk [vmem:[%s336_s9 + $0x8] sm:$0xf] %vm932_vm4, %v930_v46  ;;  %v927_v49 = vmul.f32 %v922_v47, %v895_v48 }
 0x323   : > { %v931_v50 = vpack.c.bf16 %v927_v49, %v927_v49 }
 0x325   : > { %936 = vst.msk [vmem:[%s336_s9 + $0xc] sm:$0xf] %vm932_vm4, %v931_v50 }
 0x326 PF: > { %s14_s17 = sadd.s32 1, %s1254_s17   ;;  %s1476_s15 = smov %s1250_s16 }
 0x327   : > { %p11_p5 = scmp.ge.s32.totalorder %s14_s17, 4   ;;  %s1477_s16 = smov %s1479_s18 }
 0x329   :  { %13 = sbr.rel (!%p11_p5) target bundleno = 2 (0x2), region = 83 }

// kernel: decoder_forward.23
= control target key start
LH: loop header
LB: loop body
LE: loop exit
PB: predicated region body
PF: predicated region fallthrough
CT: control target
= control target key end

     0   :  { %vm19_vm0 = vcmask 523264   ;;  %v151_v0 = vmov 0.0   ;;  %vm152_vm1 = vmmov 0   ;;  %vm47_vm2 = vcmask 261120   ;;  %s195_s1 = inlined_call_operand.vmem [shape: bf16[32,64], index: 1, kind: input, shape index: {}]   ;;  %s196_s0 = inlined_call_operand.vmem [shape: bf16[16,32], index: 0, kind: input, shape index: {}]   ;;  %s197_s2 = inlined_call_operand.vmem [shape: f32[1,64], index: 2, kind: input, shape index: {}]   ;;  %s198_s3 = inlined_call_operand.vmem [shape: bf16[16,64], index: 3, kind: output, shape index: {}]  }
   0x1   :  { %138 = vmatprep.subr.bf16.mxu0 %v151_v0  ;;  %v148_v1 = vld [vmem:[%s195_s1 + $0x8] sm:$0xff]   ;;  %142 = vmatprep.mubr.msk.bf16.mxu0 %vm152_vm1, %v151_v0  ;;  %20 = vst.msk [vmem:[#allocation2] sm:$0xff] %vm19_vm0, %v151_v0  ;;  %21 = vst.msk [vmem:[#allocation2 + $0x8] sm:$0xff] %vm19_vm0, %v151_v0  ;;  %v149_v2 = vld [vmem:[%s195_s1] sm:$0xff]   ;;  %vm119_vm3 = vcmask 519168  }
   0x2   :  { %139 = vmatpush3.bf16.msra.mxu0 %v148_v1  ;;  %v150_v3 = vld [vmem:[%s196_s0] sm:$0xff]  }
   0x3   :  { %140 = vmatprep.subr.bf16.mxu0 %v151_v0  ;;  %v130_v12 = vld [vmem:[%s197_s2] ss:$0 sm:$0xff] }
   0x6   :  { %141 = vmatpush3.bf16.msra.mxu0 %v149_v2 }
   0x8   :  { %v22_v4 = vld [vmem:[#allocation2] sm:$0xff]  ;;  %v23_v8 = vld [vmem:[#allocation2 + $0x8] sm:$0xff] }
   0x9   :  { %143 = vmatmul.mubr.msk.bf16.vlgmr.msra.gmra.mxu0 %vm47_vm2, %v150_v3 }
  0xc9   :  { %v85_v5 = vpop.f32.mrf.mxu0 }
  0xca   :  { %v92_v6 = vadd.f32 %v85_v5, %v22_v4 }
  0xcb   :  { %v144_v7 = vpop.f32.mrf.mxu0 }
  0xcc   :  { %95 = vst.msk [vmem:[#allocation2] sm:$0xff] %vm19_vm0, %v92_v6 }
  0xcd   :  { %v88_v9 = vpop.f32.mrf.mxu0 }
  0xce   :  { %v93_v10 = vadd.f32 %v88_v9, %v23_v8 }
  0xcf   :  { %v145_v11 = vpop.f32.mrf.mxu0 }
  0xd0   :  { %96 = vst.msk [vmem:[#allocation2 + $0x8] sm:$0xff] %vm19_vm0, %v93_v10 }
  0xd3   :  { %v100_v13 = vld [vmem:[#allocation2] sm:$0xff] }
  0xd4   :  { %v109_v14 = vadd.f32 %v130_v12, %v100_v13 }
  0xd6   :  { %v133_v15 = vpack.c.bf16 %v109_v14, %v109_v14 }
  0xd7   :  { %v101_v16 = vld [vmem:[#allocation2 + $0x8] sm:$0xff] }
  0xd8   :  { %120 = vst.msk [vmem:[%s198_s3] sm:$0xf] %vm119_vm3, %v133_v15  ;;  %v110_v17 = vadd.f32 %v130_v12, %v101_v16 }
  0xda   :  { %v134_v18 = vpack.c.bf16 %v110_v17, %v110_v17 }
  0xdc   :  { %121 = vst.msk [vmem:[%s198_s3 + $0x4] sm:$0xf] %vm119_vm3, %v134_v18 }

// kernel: decoder_forward.26
= control target key start
LH: loop header
LB: loop body
LE: loop exit
PB: predicated region body
PF: predicated region fallthrough
CT: control target
= control target key end

     0   :  { %vm19_vm0 = vcmask 523264   ;;  %v153_v0 = vmov 0.0   ;;  %vm154_vm1 = vmmov 0   ;;  %vm47_vm2 = vcmask 261120   ;;  %s197_s1 = inlined_call_operand.vmem [shape: bf16[32,64], index: 1, kind: input, shape index: {}]   ;;  %s198_s0 = inlined_call_operand.vmem [shape: bf16[16,32], index: 0, kind: input, shape index: {}]   ;;  %s199_s2 = inlined_call_operand.vmem [shape: f32[1,64], index: 2, kind: input, shape index: {}]   ;;  %s200_s3 = inlined_call_operand.vmem [shape: bf16[16,64], index: 3, kind: output, shape index: {}]  }
   0x1   :  { %140 = vmatprep.subr.bf16.mxu0 %v153_v0  ;;  %v150_v1 = vld [vmem:[%s197_s1 + $0x8] sm:$0xff]   ;;  %144 = vmatprep.mubr.msk.bf16.mxu0 %vm154_vm1, %v153_v0  ;;  %20 = vst.msk [vmem:[#allocation2] sm:$0xff] %vm19_vm0, %v153_v0  ;;  %21 = vst.msk [vmem:[#allocation2 + $0x8] sm:$0xff] %vm19_vm0, %v153_v0  ;;  %v151_v2 = vld [vmem:[%s197_s1] sm:$0xff]   ;;  %vm121_vm3 = vcmask 519168  }
   0x2   :  { %141 = vmatpush3.bf16.msra.mxu0 %v150_v1  ;;  %v152_v3 = vld [vmem:[%s198_s0] sm:$0xff]  }
   0x3   :  { %142 = vmatprep.subr.bf16.mxu0 %v153_v0  ;;  %v132_v12 = vld [vmem:[%s199_s2] ss:$0 sm:$0xff] }
   0x6   :  { %143 = vmatpush3.bf16.msra.mxu0 %v151_v2 }
   0x8   :  { %v22_v4 = vld [vmem:[#allocation2] sm:$0xff]  ;;  %v23_v8 = vld [vmem:[#allocation2 + $0x8] sm:$0xff] }
   0x9   :  { %145 = vmatmul.mubr.msk.bf16.vlgmr.msra.gmra.mxu0 %vm47_vm2, %v152_v3 }
  0xc9   :  { %v85_v5 = vpop.f32.mrf.mxu0 }
  0xca   :  { %v92_v6 = vadd.f32 %v85_v5, %v22_v4 }
  0xcb   :  { %v146_v7 = vpop.f32.mrf.mxu0 }
  0xcc   :  { %95 = vst.msk [vmem:[#allocation2] sm:$0xff] %vm19_vm0, %v92_v6 }
  0xcd   :  { %v88_v9 = vpop.f32.mrf.mxu0 }
  0xce   :  { %v93_v10 = vadd.f32 %v88_v9, %v23_v8 }
  0xcf   :  { %v147_v11 = vpop.f32.mrf.mxu0 }
  0xd0   :  { %96 = vst.msk [vmem:[#allocation2 + $0x8] sm:$0xff] %vm19_vm0, %v93_v10 }
  0xd3   :  { %v100_v13 = vld [vmem:[#allocation2] sm:$0xff] }
  0xd4   :  { %v109_v14 = vadd.f32 %v132_v12, %v100_v13 }
  0xd6   :  { %v111_v15 = vmax.f32 %v109_v14, 0.0 }
  0xd7   :  { %v101_v16 = vld [vmem:[#allocation2 + $0x8] sm:$0xff] }
  0xd8   :  { %v135_v17 = vpack.c.bf16 %v111_v15, %v111_v15  ;;  %v110_v18 = vadd.f32 %v132_v12, %v101_v16 }
  0xda   :  { %122 = vst.msk [vmem:[%s200_s3] sm:$0xf] %vm121_vm3, %v135_v17  ;;  %v112_v19 = vmax.f32 %v110_v18, 0.0 }
  0xdc   :  { %v136_v20 = vpack.c.bf16 %v112_v19, %v112_v19 }
  0xde   :  { %123 = vst.msk [vmem:[%s200_s3 + $0x4] sm:$0xf] %vm121_vm3, %v136_v20 }

// kernel: decoder_forward.27
= control target key start
LH: loop header
LB: loop body
LE: loop exit
PB: predicated region body
PF: predicated region fallthrough
CT: control target
= control target key end

     0   :  { %vm28_vm0 = vcmask 261120   ;;  %v247_v0 = vmov 0.0   ;;  %vm248_vm1 = vmmov 0   ;;  %vm72_vm2 = vcmask 523264   ;;  %s325_s1 = inlined_call_operand.vmem [shape: bf16[64,32], index: 1, kind: input, shape index: {}]   ;;  %s326_s0 = inlined_call_operand.vmem [shape: bf16[16,64], index: 0, kind: input, shape index: {}]   ;;  %s327_s3 = inlined_call_operand.vmem [shape: bf16[16,32], index: 3, kind: input, shape index: {}]   ;;  %s328_s2 = inlined_call_operand.vmem [shape: f32[1,32], index: 2, kind: input, shape index: {}]   ;;  %s329_s4 = inlined_call_operand.vmem [shape: f32[1,32], index: 4, kind: input, shape index: {}]   ;;  %s330_s5 = inlined_call_operand.vmem [shape: f32[1,32], index: 5, kind: input, shape index: {}]   ;;  %s331_s6 = inlined_call_operand.vmem [shape: bf16[16,32], index: 6, kind: output, shape index: {}]  }
   0x1   :  { %224 = vmatprep.subr.bf16.mxu0 %v247_v0  ;;  %v238_v1 = vld [vmem:[%s325_s1 + $0x18] sm:$0xff]   ;;  %232 = vmatprep.mubr.msk.bf16.mxu0 %vm248_vm1, %v247_v0  ;;  %29 = vst.msk [vmem:[#allocation2] sm:$0xff] %vm28_vm0, %v247_v0  ;;  %30 = vst.msk [vmem:[#allocation2 + $0x8] sm:$0xff] %vm28_vm0, %v247_v0  ;;  %v239_v2 = vld [vmem:[%s325_s1 + $0x10] sm:$0xff]   ;;  %vm195_vm3 = vcmask 257024  }
   0x2   :  { %225 = vmatpush3.bf16.msra.mxu0 %v238_v1  ;;  %v240_v3 = vld [vmem:[%s325_s1 + $0x8] sm:$0xff]   ;;  %v241_v4 = vld [vmem:[%s325_s1] sm:$0xff]  }
   0x3   :  { %226 = vmatprep.subr.bf16.mxu0 %v247_v0  ;;  %v242_v5 = vld [vmem:[%s326_s0] sm:$0xff]  }
   0x4   :  { %v216_v14 = vld [vmem:[%s327_s3] sm:$0xff]  }
   0x5   :  { %v208_v15 = vld [vmem:[%s328_s2] ss:$0 sm:$0xff]  ;;  %v217_v16 = vunpack.c.l.bf16 %v216_v14  ;;  %v218_v20 = vunpack.c.h.bf16 %v216_v14 }
   0x6   :  { %227 = vmatpush3.bf16.msra.mxu0 %v239_v2  ;;  %v209_v43 = vld [vmem:[%s329_s4] ss:$0 sm:$0xff] }
   0x7   :  { %228 = vmatprep.subr.bf16.mxu0 %v247_v0  ;;  %v210_v45 = vld [vmem:[%s330_s5] ss:$0 sm:$0xff] }
   0x8   :  { %v31_v6 = vld [vmem:[#allocation2] sm:$0xff]  ;;  %v32_v10 = vld [vmem:[#allocation2 + $0x8] sm:$0xff] }
   0xa   :  { %229 = vmatpush3.bf16.msra.mxu0 %v240_v3 }
   0xb   :  { %230 = vmatprep.subr.bf16.mxu0 %v247_v0 }
   0xe   :  { %231 = vmatpush3.bf16.msra.mxu0 %v241_v4 }
  0x11   :  { %233 = vmatmul.mubr.msk.bf16.vlgmr.msra.gmra.mxu0 %vm72_vm2, %v242_v5 }
  0xd1   :  { %v110_v7 = vpop.f32.mrf.mxu0 }
  0xd2   :  { %v117_v8 = vadd.f32 %v110_v7, %v31_v6 }
  0xd3   :  { %v234_v9 = vpop.f32.mrf.mxu0 }
  0xd4   :  { %120 = vst.msk [vmem:[#allocation2] sm:$0xff] %vm28_vm0, %v117_v8 }
  0xd5   :  { %v113_v11 = vpop.f32.mrf.mxu0 }
  0xd6   :  { %v118_v12 = vadd.f32 %v113_v11, %v32_v10 }
  0xd7   :  { %v235_v13 = vpop.f32.mrf.mxu0 }
  0xd8   :  { %121 = vst.msk [vmem:[#allocation2 + $0x8] sm:$0xff] %vm28_vm0, %v118_v12 }
  0xdb   :  { %v125_v17 = vld [vmem:[#allocation2] sm:$0xff] }
  0xdc   :  { %v134_v18 = vadd.f32 %v208_v15, %v125_v17 }
  0xde   :  { %v140_v19 = vadd.f32 %v217_v16, %v134_v18 }
  0xdf   :  { %v126_v21 = vld [vmem:[#allocation2 + $0x8] sm:$0xff] }
  0xe0   :  { %v142_v22 = vsel %vm28_vm0, %v140_v19, 0.0  ;;  %v135_v23 = vadd.f32 %v208_v15, %v126_v21 }
  0xe1   :  { %143 = vadd.xlane.f32.xlu0 %v142_v22 }
  0xe2   :  { %v141_v24 = vadd.f32 %v218_v20, %v135_v23 }
  0xe4   :  { %v145_v25 = vsel %vm28_vm0, %v141_v24, 0.0 }
  0xe5   :  { %146 = vadd.xlane.f32.xlu0 %v145_v25 }
 0x16a   :  { %v144_v26 = vpop.xlane.xlu0 %143 }
 0x16b   :  { %v149_v27 = vmul.f32 0.03125, %v144_v26 }
 0x16d   :  { %v151_v28 = vsub.f32 %v140_v19, %v149_v27 }
 0x16e   :  { %v147_v29 = vpop.xlane.xlu0 %146 }
 0x16f   :  { %v150_v30 = vmul.f32 0.03125, %v147_v29  ;;  %v153_v31 = vmul.f32 %v151_v28, %v151_v28 }
 0x171   :  { %v152_v32 = vsub.f32 %v141_v24, %v150_v30  ;;  %v155_v33 = vsel %vm28_vm0, %v153_v31, 0.0 }
 0x172   :  { %156 = vadd.xlane.f32.xlu1 %v155_v33 }
 0x173   :  { %v154_v34 = vmul.f32 %v152_v32, %v152_v32 }
 0x175   :  { %v158_v35 = vsel %vm28_vm0, %v154_v34, 0.0 }
 0x176   :  { %159 = vadd.xlane.f32.xlu1 %v158_v35 }
 0x1fb   :  { %v157_v36 = vpop.xlane.xlu1 %156 }
 0x1fc   :  { %v161_v37 = vmul.f32 0.03125, %v157_v36 }
 0x1fe   :  { %v163_v38 = vadd.f32 1e-05, %v161_v37 }
 0x1ff   :  { %v160_v39 = vpop.xlane.xlu1 %159 }
 0x200   :  { %243 = vrsqrt.f32 %v163_v38  ;;  %v162_v40 = vmul.f32 0.03125, %v160_v39 }
 0x202   :  { %v164_v41 = vadd.f32 1e-05, %v162_v40 }
 0x204   :  { %245 = vrsqrt.f32 %v164_v41 }
 0x20d   :  { %v244_v42 = vpop.eup %243 }
 0x20e   :  { %v167_v44 = vmul.f32 %v244_v42, %v151_v28 }
 0x210   :  { %v176_v46 = vmul.f32 %v209_v43, %v167_v44 }
 0x211   :  { %v246_v47 = vpop.eup %245 }
 0x212   :  { %v185_v48 = vadd.f32 %v210_v45, %v176_v46  ;;  %v168_v49 = vmul.f32 %v246_v47, %v152_v32 }
 0x214   :  { %v213_v50 = vpack.c.bf16 %v185_v48, %v185_v48  ;;  %v177_v51 = vmul.f32 %v209_v43, %v168_v49 }
 0x216   :  { %196 = vst.msk [vmem:[%s331_s6] sm:$0xf] %vm195_vm3, %v213_v50  ;;  %v186_v52 = vadd.f32 %v210_v45, %v177_v51 }
 0x218   :  { %v214_v53 = vpack.c.bf16 %v186_v52, %v186_v52 }
 0x21a   :  { %197 = vst.msk [vmem:[%s331_s6 + $0x4] sm:$0xf] %vm195_vm3, %v214_v53 }

// kernel: decoder_forward.37
= control target key start
LH: loop header
LB: loop body
LE: loop exit
PB: predicated region body
PF: predicated region fallthrough
CT: control target
= control target key end

     0   :  { %v174_v1 = vmov 0.0   ;;  %vm175_vm0 = vmmov 0   ;;  %s214_s0 = inlined_call_operand.vmem [shape: bf16[16,32], index: 0, kind: input, shape index: {}]   ;;  %s215_s1 = inlined_call_operand.vmem [shape: bf16[32,128], index: 1, kind: input, shape index: {}]   ;;  %s216_s2 = inlined_call_operand.vmem [shape: f32[1,128], index: 2, kind: input, shape index: {}]   ;;  %s217_s3 = inlined_call_operand.hbm [shape: f32[16,128], index: 3, kind: output, shape index: {}]  }
   0x1   :  { %v149_v0 = vld [vmem:[%s215_s1 + $0x8] sm:$0xff]   ;;  %136 = vmatprep.subr.bf16.mxu0 %v174_v1  ;;  %v150_v2 = vld [vmem:[%s215_s1] sm:$0xff]   ;;  %140 = vmatprep.mubr.msk.bf16.mxu0 %vm175_vm0, %v174_v1 }
   0x2   :  { %137 = vmatpush3.bf16.msra.mxu0 %v149_v0 }
   0x3   :  { %138 = vmatprep.subr.bf16.mxu0 %v174_v1 }
   0x4   :  { %8 = vsyncpa [#allocation4], 0  ;;  %v151_v3 = vld [vmem:[%s214_s0] sm:$0xff]   ;;  %vm47_vm1 = vcmask 261120   ;;  %s176_s20 = smov [#allocation3]  }
   0x5   :  { %v132_v4 = vld [vmem:[%s216_s2] ss:$0 sm:$0xff]  ;;  %s117_s21 = sshll.u32 %s176_s20, 4  ;;  %s118_s21 = int_to_ptr.vmem [resolvable:$true] %s117_s21 }
   0x6   :  { %139 = vmatpush3.bf16.msra.mxu0 %v150_v2  ;;  %s152_s1 = scalar_lea.vmem %s118_s21, 256  ;;  %p157_p1 = scmp.lt.s32.totalorder %s118_s21, %s118_s21 }
   0x7   :  { %p153_p0 = scmp.ne.s32.totalorder %s118_s21, %s152_s1  ;;  %p158_p2 = scmp.lt.s32.totalorder %s152_s1, %s152_s1 }
   0x9   :  { %141 = vmatmul.mubr.msk.bf16.vlgmr.msra.gmra.mxu0 %vm47_vm1, %v151_v3  ;;  %p159_p3 = por %p158_p2, %p157_p1 }
   0xb   :  { %p160_p4 = pnand %p159_p3, %p153_p0 }
  0xc9   :  { %v85_v5 = vpop.f32.mrf.mxu0 }
  0xca   :  { %v108_v6 = vadd.f32 %v132_v4, %v85_v5 }
  0xcb   :  { %v142_v7 = vpop.f32.mrf.mxu0 }
  0xcc   :  { %110 = vst [vmem:[#allocation3] sm:$0xff] %v108_v6 }
  0xcd   :  { %v88_v8 = vpop.f32.mrf.mxu0 }
  0xce   :  { %v109_v9 = vadd.f32 %v132_v4, %v88_v8 }
  0xcf   :  { %v143_v10 = vpop.f32.mrf.mxu0 }
  0xd0   :  { %111 = vst [vmem:[#allocation3 + $0x8] sm:$0xff] %v109_v9 }
  0xd1   :  { %163 = shalt.err (!%p160_p4)
}
  0xd2   :  { %s177_s0 = smov 128   ;;  %s178_s2 = smov 8  }
  0xd3   :  { %123 = dma.vmem_to_hbm [thread:$0]  %s118_s21, 256, %s217_s3, [#allocation4], %s177_s0, %s177_s0, %s178_s2  }
  0xd4   :  { %172 = dma.done.wait [#allocation4], 256  }
  0xd5   :  { %173 = vsyncadd [#allocation4], 4294967040 }
  0xd6   :  { %127 = vsyncpa [#allocation4], 1 }

</bundles_post_ra>
